<compile_context>
chip_gen: v7x
topology: tpu7x:2x2x1
jax: 0.10.0
libtpu: 0.0.40
codegen_flags: <defaults>
</compile_context>

<pallas_src>
import jax
import jax.numpy as jnp
from jax import lax
from jax.experimental import pallas as pl
from jax.experimental.pallas import tpu as pltpu


# ------------------------------ fused kernel ---------------------------------

def _make_fused_kernel(B, S, H, num_layers, num_tail):
    """Kernel computing the full forward pass for one (B, S, D_in) batch."""

    n_mid = num_tail - 1  # tail Linear layers computed in normal orientation

    def kernel(*refs):
        # refs layout (inputs):
        #   x_ref                               (S*B, D_in)  TIME-major rows s*B+b
        #   per LSTM layer l: wih_l (D_l,4H), whh_l (H,4H), b_l (1,4H)
        #                     (gate columns pre-permuted to [i, f, o, g])
        #   mid tail weights  (in_i, out_i)   x n_mid   (already transposed)
        #   mid tail biases   (1, out_i)      x n_mid
        #   last tail weight  (num_classes, in_last)   (original orientation)
        #   last tail bias    (num_classes, 1)
        # outputs:
        #   pred_ref                            (1, S*B)   lane-dense, time-major
        # scratch:
        #   out_buf                             (S*B, H)   last-layer h per step
        idx = 0
        x_ref = refs[idx]; idx += 1
        lstm_refs = []
        for _ in range(num_layers):
            lstm_refs.append((refs[idx], refs[idx + 1], refs[idx + 2]))
            idx += 3
        mid_w_refs = refs[idx: idx + n_mid]; idx += n_mid
        mid_b_refs = refs[idx: idx + n_mid]; idx += n_mid
        w_last_ref = refs[idx]; idx += 1
        b_last_ref = refs[idx]; idx += 1
        pred_ref = refs[idx]; idx += 1
        out_buf = refs[idx]

        def cell(gates, c):
            # gate columns are [i, f, o, g]: one sigmoid slab + one tanh per step
            sig = jax.nn.sigmoid(gates[:, 0:3 * H])
            i_g = sig[:, 0 * H:1 * H]
            f_g = sig[:, 1 * H:2 * H]
            o_g = sig[:, 2 * H:3 * H]
            g_g = jnp.tanh(gates[:, 3 * H:4 * H])
            c_new = f_g * c + i_g * g_g
            h_new = o_g * jnp.tanh(c_new)
            return h_new, c_new

        # ---- layer 0: hoisted full-sequence input projection (one MXU matmul,
        #      M = S*B) — only h @ W_hh stays on the serial chain.
        wih0_ref, whh0_ref, b0_ref = lstm_refs[0]
        xg0 = jnp.dot(x_ref[...], wih0_ref[...],
                      preferred_element_type=jnp.float32) + b0_ref[...]
        whh0 = whh0_ref[...]

        # weights of deeper layers loaded once, outside the time loop
        deep = [(w[...], u[...], b[...]) for (w, u, b) in lstm_refs[1:]]

        h = [jnp.zeros((B, H), jnp.float32) for _ in range(num_layers)]
        c = [jnp.zeros((B, H), jnp.float32) for _ in range(num_layers)]

        # Fully unrolled time loop (S is small & static).  Each step runs
        # layer 0 then feeds h0_t straight into layer 1 (etc.); h_{l}(t+1)
        # does NOT depend on h_{l+1}(t), so the per-layer recurrence chains
        # overlap (wavefront) under the LLO scheduler.
        # TODO(synk): if S/B grow, switch to lax.fori_loop + grid tiling so the
        # unrolled live ranges / compile time don't blow up.
        for t in range(S):
            x_t = xg0[t * B:(t + 1) * B, :]          # contiguous static slice
            gates0 = x_t + jnp.dot(h[0], whh0,
                                   preferred_element_type=jnp.float32)
            h[0], c[0] = cell(gates0, c[0])
            inp_t = h[0]
            for l in range(1, num_layers):
                wih_l, whh_l, b_l = deep[l - 1]
                gates_l = (jnp.dot(inp_t, wih_l,
                                   preferred_element_type=jnp.float32)
                           + jnp.dot(h[l], whh_l,
                                     preferred_element_type=jnp.float32)
                           + b_l)
                h[l], c[l] = cell(gates_l, c[l])
                inp_t = h[l]
            # last-layer output -> scratch, static-offset store (no concat tree)
            out_buf[t * B:(t + 1) * B, :] = inp_t

        # ---- tail: Sequential(ReLU, Linear) x num_tail, applied row-wise, so
        # it can run on the time-major buffer; row order fixed in the wrapper.
        act = out_buf[...]                           # (S*B, H)
        for w_ref, b_ref in zip(mid_w_refs, mid_b_refs):
            act = jnp.dot(jnp.maximum(act, 0.0), w_ref[...],
                          preferred_element_type=jnp.float32) + b_ref[...]
        # last Linear as W_last @ relu(act)^T  -> (num_classes, S*B), lane-dense
        act_t = lax.dot_general(
            w_last_ref[...], jnp.maximum(act, 0.0),
            dimension_numbers=(((1,), (1,)), ((), ())),
            preferred_element_type=jnp.float32) + b_last_ref[...]

        # pred = tail_out[:, [0]] * exp(tail_out[:, [1]])  (rows here)
        pred_ref[...] = act_t[0:1, :] * jnp.exp(act_t[1:2, :])

    return kernel


# ------------------------------ model wrapper --------------------------------

def _reorder_gates(a):
    """Permute the last (4H) axis from PyTorch order [i,f,g,o] to [i,f,o,g]."""
    H = a.shape[-1] // 4
    return jnp.concatenate(
        [a[..., 0 * H:1 * H], a[..., 1 * H:2 * H],
         a[..., 3 * H:4 * H], a[..., 2 * H:3 * H]], axis=-1)


def lstm_baseline_lite_forward(x_in, params, hidden_size):
    """x_in: (B, S, input_size) -> pred: (B*S, 1) in PyTorch row order b*S+s."""
    B, S, D = x_in.shape
    H = hidden_size
    num_layers = len(params["lstm"])
    num_tail = len(params["tail_w"])

    # time-major flat input: row s*B + b (tiny XLA transpose, outside kernel)
    x_tm = jnp.transpose(x_in.astype(jnp.float32), (1, 0, 2)).reshape(S * B, D)

    flat_inputs = [x_tm]
    for (w_ih, w_hh, b_ih, b_hh) in params["lstm"]:
        wih_t = _reorder_gates(jnp.asarray(w_ih, jnp.float32).T)       # (D_l, 4H)
        whh_t = _reorder_gates(jnp.asarray(w_hh, jnp.float32).T)       # (H, 4H)
        b = _reorder_gates((b_ih + b_hh).astype(jnp.float32)).reshape(1, 4 * H)
        flat_inputs += [wih_t, whh_t, b]

    # mid tail layers: transposed weights + row biases; last layer: original
    # orientation weight (num_classes, in) + column bias (num_classes, 1)
    mid_ws = [jnp.asarray(w, jnp.float32).T for w in params["tail_w"][:-1]]
    mid_bs = [jnp.asarray(b, jnp.float32).reshape(1, -1)
              for b in params["tail_b"][:-1]]
    w_last = jnp.asarray(params["tail_w"][-1], jnp.float32)            # (2, in)
    b_last = jnp.asarray(params["tail_b"][-1], jnp.float32).reshape(-1, 1)
    flat_inputs += mid_ws + mid_bs + [w_last, b_last]

    vmem = pl.BlockSpec(memory_space=pltpu.MemorySpace.VMEM)
    kernel = _make_fused_kernel(B, S, H, num_layers, num_tail)
    pred_tm = pl.pallas_call(
        kernel,
        out_shape=jax.ShapeDtypeStruct((1, S * B), jnp.float32),
        in_specs=[vmem] * len(flat_inputs),
        out_specs=vmem,
        scratch_shapes=[pltpu.VMEM((S * B, H), jnp.float32)],
    )(*flat_inputs)

    # time-major (1, S*B) -> batch-major (B*S, 1): matches lstm_out.reshape(-1,H)
    return pred_tm.reshape(S, B).transpose(1, 0).reshape(B * S, 1)


# ----------------------------- parameter init --------------------------------

def init_params(key, input_size, hidden_size, num_layers, nn_inter_dim, tail_length):
    num_classes = 2
    params = {"lstm": [], "tail_w": [], "tail_b": []}
    keys = jax.random.split(key, num_layers * 4 + tail_length * 2)
    idx = 0
    k = 1.0 / (hidden_size ** 0.5)
    for l in range(num_layers):
        din = input_size if l == 0 else hidden_size
        w_ih = jax.random.uniform(keys[idx], (4 * hidden_size, din), minval=-k, maxval=k); idx += 1
        w_hh = jax.random.uniform(keys[idx], (4 * hidden_size, hidden_size), minval=-k, maxval=k); idx += 1
        b_ih = jax.random.uniform(keys[idx], (4 * hidden_size,), minval=-k, maxval=k); idx += 1
        b_hh = jax.random.uniform(keys[idx], (4 * hidden_size,), minval=-k, maxval=k); idx += 1
        params["lstm"].append((w_ih, w_hh, b_ih, b_hh))
    for i in range(tail_length):
        in_size = hidden_size if i == 0 else nn_inter_dim
        out_size = num_classes if i == tail_length - 1 else nn_inter_dim
        kk = 1.0 / (in_size ** 0.5)
        w = jax.random.uniform(keys[idx], (out_size, in_size), minval=-kk, maxval=kk); idx += 1
        b = jax.random.uniform(keys[idx], (out_size,), minval=-kk, maxval=kk); idx += 1
        params["tail_w"].append(w)
        params["tail_b"].append(b)
    return params


# --------------------------- pure-JAX reference -------------------------------

def reference_forward(x_in, params, hidden_size):
    B, S, _ = x_in.shape
    h_seq = x_in.astype(jnp.float32)
    for (w_ih, w_hh, b_ih, b_hh) in params["lstm"]:
        def step(carry, x_t, w_ih=w_ih, w_hh=w_hh, b_ih=b_ih, b_hh=b_hh):
            h, c = carry
            gates = x_t @ w_ih.T + b_ih + h @ w_hh.T + b_hh
            i, f, g, o = jnp.split(gates, 4, axis=-1)
            i = jax.nn.sigmoid(i); f = jax.nn.sigmoid(f)
            g = jnp.tanh(g); o = jax.nn.sigmoid(o)
            c = f * c + i * g
            h = o * jnp.tanh(c)
            return (h, c), h
        h0 = jnp.zeros((B, hidden_size)); c0 = jnp.zeros((B, hidden_size))
        _, ys = jax.lax.scan(step, (h0, c0), jnp.swapaxes(h_seq, 0, 1))
        h_seq = jnp.swapaxes(ys, 0, 1)
    out = h_seq.reshape(B * S, hidden_size)
    for w, b in zip(params["tail_w"], params["tail_b"]):
        out = jnp.maximum(out, 0.0) @ w.T + b
    return out[:, 0:1] * jnp.exp(out[:, 1:2])


# ----------------------------------- main -------------------------------------

if __name__ == "__main__":
    input_size, hidden_size, num_layers = 4, 32, 2
    nn_inter_dim, tail_length = 16, 2
    B, S = 2, 8

    key = jax.random.PRNGKey(0)
    kx, kp = jax.random.split(key)
    x_in = jax.random.normal(kx, (B, S, input_size), dtype=jnp.float32)
    params = init_params(kp, input_size, hidden_size, num_layers,
                         nn_inter_dim, tail_length)

    fwd = jax.jit(lambda x, p: lstm_baseline_lite_forward(x, p, hidden_size))
    pred = fwd(x_in, params)
    pred = jax.block_until_ready(pred)

    ref = reference_forward(x_in, params, hidden_size)
    assert pred.shape == (B * S, 1), pred.shape
    assert jnp.allclose(pred, ref, rtol=1e-4, atol=1e-5), \
        f"max abs err {jnp.max(jnp.abs(pred - ref))}"
    print("KERNEL_OK")
</pallas_src>

<mosaic_0001>
module attributes {stable_mosaic.version = 11 : i64} {
  func.func @kernel(%arg0: memref<16x4xf32, #tpu.memory_space<vmem>>, %arg1: memref<4x128xf32, #tpu.memory_space<vmem>>, %arg2: memref<32x128xf32, #tpu.memory_space<vmem>>, %arg3: memref<1x128xf32, #tpu.memory_space<vmem>>, %arg4: memref<32x128xf32, #tpu.memory_space<vmem>>, %arg5: memref<32x128xf32, #tpu.memory_space<vmem>>, %arg6: memref<1x128xf32, #tpu.memory_space<vmem>>, %arg7: memref<32x16xf32, #tpu.memory_space<vmem>>, %arg8: memref<1x16xf32, #tpu.memory_space<vmem>>, %arg9: memref<2x16xf32, #tpu.memory_space<vmem>>, %arg10: memref<2x1xf32, #tpu.memory_space<vmem>>, %arg11: memref<1x16xf32, #tpu.memory_space<vmem>>, %arg12: memref<16x32xf32, #tpu.memory_space<vmem>>) attributes {dimension_semantics = [], scalar_prefetch = 0 : i64, scratch_operands = 1 : i64, tpu.core_type = #tpu.core_type<tc>} {
    %c0 = arith.constant 0 : index
    %c0_0 = arith.constant 0 : index
    %0 = vector.load %arg0[%c0, %c0_0] : memref<16x4xf32, #tpu.memory_space<vmem>>, vector<16x4xf32>
    %c0_1 = arith.constant 0 : index
    %c0_2 = arith.constant 0 : index
    %1 = vector.load %arg1[%c0_1, %c0_2] : memref<4x128xf32, #tpu.memory_space<vmem>>, vector<4x128xf32>
    %cst = arith.constant dense<0.000000e+00> : vector<16x128xf32>
    %2 = tpu.matmul %0, %1, %cst {dimension_numbers = #tpu.dot_dimension_numbers<[1], [0], [0], [1], [0, 0, 1, 1], [], []>} : vector<16x4xf32>, vector<4x128xf32>, vector<16x128xf32> -> vector<16x128xf32>
    %c0_3 = arith.constant 0 : index
    %c0_4 = arith.constant 0 : index
    %3 = vector.load %arg3[%c0_3, %c0_4] : memref<1x128xf32, #tpu.memory_space<vmem>>, vector<1x128xf32>
    %4 = vector.broadcast %3 : vector<1x128xf32> to vector<16x128xf32>
    %5 = arith.addf %2, %4 : vector<16x128xf32>
    %c0_5 = arith.constant 0 : index
    %c0_6 = arith.constant 0 : index
    %6 = vector.load %arg2[%c0_5, %c0_6] : memref<32x128xf32, #tpu.memory_space<vmem>>, vector<32x128xf32>
    %c0_7 = arith.constant 0 : index
    %c0_8 = arith.constant 0 : index
    %7 = vector.load %arg4[%c0_7, %c0_8] : memref<32x128xf32, #tpu.memory_space<vmem>>, vector<32x128xf32>
    %c0_9 = arith.constant 0 : index
    %c0_10 = arith.constant 0 : index
    %8 = vector.load %arg5[%c0_9, %c0_10] : memref<32x128xf32, #tpu.memory_space<vmem>>, vector<32x128xf32>
    %c0_11 = arith.constant 0 : index
    %c0_12 = arith.constant 0 : index
    %9 = vector.load %arg6[%c0_11, %c0_12] : memref<1x128xf32, #tpu.memory_space<vmem>>, vector<1x128xf32>
    %cst_13 = arith.constant 0.000000e+00 : f32
    %10 = vector.broadcast %cst_13 : f32 to vector<2x32xf32>
    %cst_14 = arith.constant 0.000000e+00 : f32
    %11 = vector.broadcast %cst_14 : f32 to vector<2x32xf32>
    %cst_15 = arith.constant 0.000000e+00 : f32
    %12 = vector.broadcast %cst_15 : f32 to vector<2x32xf32>
    %cst_16 = arith.constant 0.000000e+00 : f32
    %13 = vector.broadcast %cst_16 : f32 to vector<2x32xf32>
    %14 = vector.extract_strided_slice %5 {offsets = [0, 0], sizes = [2, 128], strides = [1, 1]} : vector<16x128xf32> to vector<2x128xf32>
    %cst_17 = arith.constant dense<0.000000e+00> : vector<2x128xf32>
    %15 = tpu.matmul %10, %6, %cst_17 {dimension_numbers = #tpu.dot_dimension_numbers<[1], [0], [0], [1], [0, 0, 1, 1], [], []>} : vector<2x32xf32>, vector<32x128xf32>, vector<2x128xf32> -> vector<2x128xf32>
    %16 = arith.addf %14, %15 : vector<2x128xf32>
    %17 = vector.extract_strided_slice %16 {offsets = [0, 0], sizes = [2, 96], strides = [1, 1]} : vector<2x128xf32> to vector<2x96xf32>
    %18 = arith.negf %17 : vector<2x96xf32>
    %19 = math.exp %18 : vector<2x96xf32>
    %cst_18 = arith.constant 1.000000e+00 : f32
    %20 = vector.broadcast %cst_18 : f32 to vector<2x96xf32>
    %21 = arith.addf %20, %19 : vector<2x96xf32>
    %22 = arith.divf %20, %21 : vector<2x96xf32>
    %23 = vector.extract_strided_slice %22 {offsets = [0, 0], sizes = [2, 32], strides = [1, 1]} : vector<2x96xf32> to vector<2x32xf32>
    %24 = vector.extract_strided_slice %22 {offsets = [0, 32], sizes = [2, 32], strides = [1, 1]} : vector<2x96xf32> to vector<2x32xf32>
    %25 = vector.extract_strided_slice %22 {offsets = [0, 64], sizes = [2, 32], strides = [1, 1]} : vector<2x96xf32> to vector<2x32xf32>
    %26 = vector.extract_strided_slice %16 {offsets = [0, 96], sizes = [2, 32], strides = [1, 1]} : vector<2x128xf32> to vector<2x32xf32>
    %27 = math.tanh %26 : vector<2x32xf32>
    %28 = arith.mulf %24, %12 : vector<2x32xf32>
    %29 = arith.mulf %23, %27 : vector<2x32xf32>
    %30 = arith.addf %28, %29 : vector<2x32xf32>
    %31 = math.tanh %30 : vector<2x32xf32>
    %32 = arith.mulf %25, %31 : vector<2x32xf32>
    %cst_19 = arith.constant dense<0.000000e+00> : vector<2x128xf32>
    %33 = tpu.matmul %32, %7, %cst_19 {dimension_numbers = #tpu.dot_dimension_numbers<[1], [0], [0], [1], [0, 0, 1, 1], [], []>} : vector<2x32xf32>, vector<32x128xf32>, vector<2x128xf32> -> vector<2x128xf32>
    %cst_20 = arith.constant dense<0.000000e+00> : vector<2x128xf32>
    %34 = tpu.matmul %11, %8, %cst_20 {dimension_numbers = #tpu.dot_dimension_numbers<[1], [0], [0], [1], [0, 0, 1, 1], [], []>} : vector<2x32xf32>, vector<32x128xf32>, vector<2x128xf32> -> vector<2x128xf32>
    %35 = arith.addf %33, %34 : vector<2x128xf32>
    %36 = vector.broadcast %9 : vector<1x128xf32> to vector<2x128xf32>
    %37 = arith.addf %35, %36 : vector<2x128xf32>
    %38 = vector.extract_strided_slice %37 {offsets = [0, 0], sizes = [2, 96], strides = [1, 1]} : vector<2x128xf32> to vector<2x96xf32>
    %39 = arith.negf %38 : vector<2x96xf32>
    %40 = math.exp %39 : vector<2x96xf32>
    %cst_21 = arith.constant 1.000000e+00 : f32
    %41 = vector.broadcast %cst_21 : f32 to vector<2x96xf32>
    %42 = arith.addf %41, %40 : vector<2x96xf32>
    %43 = arith.divf %41, %42 : vector<2x96xf32>
    %44 = vector.extract_strided_slice %43 {offsets = [0, 0], sizes = [2, 32], strides = [1, 1]} : vector<2x96xf32> to vector<2x32xf32>
    %45 = vector.extract_strided_slice %43 {offsets = [0, 32], sizes = [2, 32], strides = [1, 1]} : vector<2x96xf32> to vector<2x32xf32>
    %46 = vector.extract_strided_slice %43 {offsets = [0, 64], sizes = [2, 32], strides = [1, 1]} : vector<2x96xf32> to vector<2x32xf32>
    %47 = vector.extract_strided_slice %37 {offsets = [0, 96], sizes = [2, 32], strides = [1, 1]} : vector<2x128xf32> to vector<2x32xf32>
    %48 = math.tanh %47 : vector<2x32xf32>
    %49 = arith.mulf %45, %13 : vector<2x32xf32>
    %50 = arith.mulf %44, %48 : vector<2x32xf32>
    %51 = arith.addf %49, %50 : vector<2x32xf32>
    %52 = math.tanh %51 : vector<2x32xf32>
    %53 = arith.mulf %46, %52 : vector<2x32xf32>
    %c0_22 = arith.constant 0 : index
    %c0_23 = arith.constant 0 : index
    %54 = vector.load %arg12[%c0_22, %c0_23] : memref<16x32xf32, #tpu.memory_space<vmem>>, vector<2x32xf32>
    tpu.vector_store %arg12[%c0_22, %c0_23], %53 {strides = array<i32>} : memref<16x32xf32, #tpu.memory_space<vmem>>, vector<2x32xf32>,
    %55 = vector.extract_strided_slice %5 {offsets = [2, 0], sizes = [2, 128], strides = [1, 1]} : vector<16x128xf32> to vector<2x128xf32>
    %cst_24 = arith.constant dense<0.000000e+00> : vector<2x128xf32>
    %56 = tpu.matmul %32, %6, %cst_24 {dimension_numbers = #tpu.dot_dimension_numbers<[1], [0], [0], [1], [0, 0, 1, 1], [], []>} : vector<2x32xf32>, vector<32x128xf32>, vector<2x128xf32> -> vector<2x128xf32>
    %57 = arith.addf %55, %56 : vector<2x128xf32>
    %58 = vector.extract_strided_slice %57 {offsets = [0, 0], sizes = [2, 96], strides = [1, 1]} : vector<2x128xf32> to vector<2x96xf32>
    %59 = arith.negf %58 : vector<2x96xf32>
    %60 = math.exp %59 : vector<2x96xf32>
    %cst_25 = arith.constant 1.000000e+00 : f32
    %61 = vector.broadcast %cst_25 : f32 to vector<2x96xf32>
    %62 = arith.addf %61, %60 : vector<2x96xf32>
    %63 = arith.divf %61, %62 : vector<2x96xf32>
    %64 = vector.extract_strided_slice %63 {offsets = [0, 0], sizes = [2, 32], strides = [1, 1]} : vector<2x96xf32> to vector<2x32xf32>
    %65 = vector.extract_strided_slice %63 {offsets = [0, 32], sizes = [2, 32], strides = [1, 1]} : vector<2x96xf32> to vector<2x32xf32>
    %66 = vector.extract_strided_slice %63 {offsets = [0, 64], sizes = [2, 32], strides = [1, 1]} : vector<2x96xf32> to vector<2x32xf32>
    %67 = vector.extract_strided_slice %57 {offsets = [0, 96], sizes = [2, 32], strides = [1, 1]} : vector<2x128xf32> to vector<2x32xf32>
    %68 = math.tanh %67 : vector<2x32xf32>
    %69 = arith.mulf %65, %30 : vector<2x32xf32>
    %70 = arith.mulf %64, %68 : vector<2x32xf32>
    %71 = arith.addf %69, %70 : vector<2x32xf32>
    %72 = math.tanh %71 : vector<2x32xf32>
    %73 = arith.mulf %66, %72 : vector<2x32xf32>
    %cst_26 = arith.constant dense<0.000000e+00> : vector<2x128xf32>
    %74 = tpu.matmul %73, %7, %cst_26 {dimension_numbers = #tpu.dot_dimension_numbers<[1], [0], [0], [1], [0, 0, 1, 1], [], []>} : vector<2x32xf32>, vector<32x128xf32>, vector<2x128xf32> -> vector<2x128xf32>
    %cst_27 = arith.constant dense<0.000000e+00> : vector<2x128xf32>
    %75 = tpu.matmul %53, %8, %cst_27 {dimension_numbers = #tpu.dot_dimension_numbers<[1], [0], [0], [1], [0, 0, 1, 1], [], []>} : vector<2x32xf32>, vector<32x128xf32>, vector<2x128xf32> -> vector<2x128xf32>
    %76 = arith.addf %74, %75 : vector<2x128xf32>
    %77 = vector.broadcast %9 : vector<1x128xf32> to vector<2x128xf32>
    %78 = arith.addf %76, %77 : vector<2x128xf32>
    %79 = vector.extract_strided_slice %78 {offsets = [0, 0], sizes = [2, 96], strides = [1, 1]} : vector<2x128xf32> to vector<2x96xf32>
    %80 = arith.negf %79 : vector<2x96xf32>
    %81 = math.exp %80 : vector<2x96xf32>
    %cst_28 = arith.constant 1.000000e+00 : f32
    %82 = vector.broadcast %cst_28 : f32 to vector<2x96xf32>
    %83 = arith.addf %82, %81 : vector<2x96xf32>
    %84 = arith.divf %82, %83 : vector<2x96xf32>
    %85 = vector.extract_strided_slice %84 {offsets = [0, 0], sizes = [2, 32], strides = [1, 1]} : vector<2x96xf32> to vector<2x32xf32>
    %86 = vector.extract_strided_slice %84 {offsets = [0, 32], sizes = [2, 32], strides = [1, 1]} : vector<2x96xf32> to vector<2x32xf32>
    %87 = vector.extract_strided_slice %84 {offsets = [0, 64], sizes = [2, 32], strides = [1, 1]} : vector<2x96xf32> to vector<2x32xf32>
    %88 = vector.extract_strided_slice %78 {offsets = [0, 96], sizes = [2, 32], strides = [1, 1]} : vector<2x128xf32> to vector<2x32xf32>
    %89 = math.tanh %88 : vector<2x32xf32>
    %90 = arith.mulf %86, %51 : vector<2x32xf32>
    %91 = arith.mulf %85, %89 : vector<2x32xf32>
    %92 = arith.addf %90, %91 : vector<2x32xf32>
    %93 = math.tanh %92 : vector<2x32xf32>
    %94 = arith.mulf %87, %93 : vector<2x32xf32>
    %c2 = arith.constant 2 : index
    %c0_29 = arith.constant 0 : index
    %95 = vector.load %arg12[%c2, %c0_29] : memref<16x32xf32, #tpu.memory_space<vmem>>, vector<2x32xf32>
    tpu.vector_store %arg12[%c2, %c0_29], %94 {strides = array<i32>} : memref<16x32xf32, #tpu.memory_space<vmem>>, vector<2x32xf32>,
    %96 = vector.extract_strided_slice %5 {offsets = [4, 0], sizes = [2, 128], strides = [1, 1]} : vector<16x128xf32> to vector<2x128xf32>
    %cst_30 = arith.constant dense<0.000000e+00> : vector<2x128xf32>
    %97 = tpu.matmul %73, %6, %cst_30 {dimension_numbers = #tpu.dot_dimension_numbers<[1], [0], [0], [1], [0, 0, 1, 1], [], []>} : vector<2x32xf32>, vector<32x128xf32>, vector<2x128xf32> -> vector<2x128xf32>
    %98 = arith.addf %96, %97 : vector<2x128xf32>
    %99 = vector.extract_strided_slice %98 {offsets = [0, 0], sizes = [2, 96], strides = [1, 1]} : vector<2x128xf32> to vector<2x96xf32>
    %100 = arith.negf %99 : vector<2x96xf32>
    %101 = math.exp %100 : vector<2x96xf32>
    %cst_31 = arith.constant 1.000000e+00 : f32
    %102 = vector.broadcast %cst_31 : f32 to vector<2x96xf32>
    %103 = arith.addf %102, %101 : vector<2x96xf32>
    %104 = arith.divf %102, %103 : vector<2x96xf32>
    %105 = vector.extract_strided_slice %104 {offsets = [0, 0], sizes = [2, 32], strides = [1, 1]} : vector<2x96xf32> to vector<2x32xf32>
    %106 = vector.extract_strided_slice %104 {offsets = [0, 32], sizes = [2, 32], strides = [1, 1]} : vector<2x96xf32> to vector<2x32xf32>
    %107 = vector.extract_strided_slice %104 {offsets = [0, 64], sizes = [2, 32], strides = [1, 1]} : vector<2x96xf32> to vector<2x32xf32>
    %108 = vector.extract_strided_slice %98 {offsets = [0, 96], sizes = [2, 32], strides = [1, 1]} : vector<2x128xf32> to vector<2x32xf32>
    %109 = math.tanh %108 : vector<2x32xf32>
    %110 = arith.mulf %106, %71 : vector<2x32xf32>
    %111 = arith.mulf %105, %109 : vector<2x32xf32>
    %112 = arith.addf %110, %111 : vector<2x32xf32>
    %113 = math.tanh %112 : vector<2x32xf32>
    %114 = arith.mulf %107, %113 : vector<2x32xf32>
    %cst_32 = arith.constant dense<0.000000e+00> : vector<2x128xf32>
    %115 = tpu.matmul %114, %7, %cst_32 {dimension_numbers = #tpu.dot_dimension_numbers<[1], [0], [0], [1], [0, 0, 1, 1], [], []>} : vector<2x32xf32>, vector<32x128xf32>, vector<2x128xf32> -> vector<2x128xf32>
    %cst_33 = arith.constant dense<0.000000e+00> : vector<2x128xf32>
    %116 = tpu.matmul %94, %8, %cst_33 {dimension_numbers = #tpu.dot_dimension_numbers<[1], [0], [0], [1], [0, 0, 1, 1], [], []>} : vector<2x32xf32>, vector<32x128xf32>, vector<2x128xf32> -> vector<2x128xf32>
    %117 = arith.addf %115, %116 : vector<2x128xf32>
    %118 = vector.broadcast %9 : vector<1x128xf32> to vector<2x128xf32>
    %119 = arith.addf %117, %118 : vector<2x128xf32>
    %120 = vector.extract_strided_slice %119 {offsets = [0, 0], sizes = [2, 96], strides = [1, 1]} : vector<2x128xf32> to vector<2x96xf32>
    %121 = arith.negf %120 : vector<2x96xf32>
    %122 = math.exp %121 : vector<2x96xf32>
    %cst_34 = arith.constant 1.000000e+00 : f32
    %123 = vector.broadcast %cst_34 : f32 to vector<2x96xf32>
    %124 = arith.addf %123, %122 : vector<2x96xf32>
    %125 = arith.divf %123, %124 : vector<2x96xf32>
    %126 = vector.extract_strided_slice %125 {offsets = [0, 0], sizes = [2, 32], strides = [1, 1]} : vector<2x96xf32> to vector<2x32xf32>
    %127 = vector.extract_strided_slice %125 {offsets = [0, 32], sizes = [2, 32], strides = [1, 1]} : vector<2x96xf32> to vector<2x32xf32>
    %128 = vector.extract_strided_slice %125 {offsets = [0, 64], sizes = [2, 32], strides = [1, 1]} : vector<2x96xf32> to vector<2x32xf32>
    %129 = vector.extract_strided_slice %119 {offsets = [0, 96], sizes = [2, 32], strides = [1, 1]} : vector<2x128xf32> to vector<2x32xf32>
    %130 = math.tanh %129 : vector<2x32xf32>
    %131 = arith.mulf %127, %92 : vector<2x32xf32>
    %132 = arith.mulf %126, %130 : vector<2x32xf32>
    %133 = arith.addf %131, %132 : vector<2x32xf32>
    %134 = math.tanh %133 : vector<2x32xf32>
    %135 = arith.mulf %128, %134 : vector<2x32xf32>
    %c4 = arith.constant 4 : index
    %c0_35 = arith.constant 0 : index
    %136 = vector.load %arg12[%c4, %c0_35] : memref<16x32xf32, #tpu.memory_space<vmem>>, vector<2x32xf32>
    tpu.vector_store %arg12[%c4, %c0_35], %135 {strides = array<i32>} : memref<16x32xf32, #tpu.memory_space<vmem>>, vector<2x32xf32>,
    %137 = vector.extract_strided_slice %5 {offsets = [6, 0], sizes = [2, 128], strides = [1, 1]} : vector<16x128xf32> to vector<2x128xf32>
    %cst_36 = arith.constant dense<0.000000e+00> : vector<2x128xf32>
    %138 = tpu.matmul %114, %6, %cst_36 {dimension_numbers = #tpu.dot_dimension_numbers<[1], [0], [0], [1], [0, 0, 1, 1], [], []>} : vector<2x32xf32>, vector<32x128xf32>, vector<2x128xf32> -> vector<2x128xf32>
    %139 = arith.addf %137, %138 : vector<2x128xf32>
    %140 = vector.extract_strided_slice %139 {offsets = [0, 0], sizes = [2, 96], strides = [1, 1]} : vector<2x128xf32> to vector<2x96xf32>
    %141 = arith.negf %140 : vector<2x96xf32>
    %142 = math.exp %141 : vector<2x96xf32>
    %cst_37 = arith.constant 1.000000e+00 : f32
    %143 = vector.broadcast %cst_37 : f32 to vector<2x96xf32>
    %144 = arith.addf %143, %142 : vector<2x96xf32>
    %145 = arith.divf %143, %144 : vector<2x96xf32>
    %146 = vector.extract_strided_slice %145 {offsets = [0, 0], sizes = [2, 32], strides = [1, 1]} : vector<2x96xf32> to vector<2x32xf32>
    %147 = vector.extract_strided_slice %145 {offsets = [0, 32], sizes = [2, 32], strides = [1, 1]} : vector<2x96xf32> to vector<2x32xf32>
    %148 = vector.extract_strided_slice %145 {offsets = [0, 64], sizes = [2, 32], strides = [1, 1]} : vector<2x96xf32> to vector<2x32xf32>
    %149 = vector.extract_strided_slice %139 {offsets = [0, 96], sizes = [2, 32], strides = [1, 1]} : vector<2x128xf32> to vector<2x32xf32>
    %150 = math.tanh %149 : vector<2x32xf32>
    %151 = arith.mulf %147, %112 : vector<2x32xf32>
    %152 = arith.mulf %146, %150 : vector<2x32xf32>
    %153 = arith.addf %151, %152 : vector<2x32xf32>
    %154 = math.tanh %153 : vector<2x32xf32>
    %155 = arith.mulf %148, %154 : vector<2x32xf32>
    %cst_38 = arith.constant dense<0.000000e+00> : vector<2x128xf32>
    %156 = tpu.matmul %155, %7, %cst_38 {dimension_numbers = #tpu.dot_dimension_numbers<[1], [0], [0], [1], [0, 0, 1, 1], [], []>} : vector<2x32xf32>, vector<32x128xf32>, vector<2x128xf32> -> vector<2x128xf32>
    %cst_39 = arith.constant dense<0.000000e+00> : vector<2x128xf32>
    %157 = tpu.matmul %135, %8, %cst_39 {dimension_numbers = #tpu.dot_dimension_numbers<[1], [0], [0], [1], [0, 0, 1, 1], [], []>} : vector<2x32xf32>, vector<32x128xf32>, vector<2x128xf32> -> vector<2x128xf32>
    %158 = arith.addf %156, %157 : vector<2x128xf32>
    %159 = vector.broadcast %9 : vector<1x128xf32> to vector<2x128xf32>
    %160 = arith.addf %158, %159 : vector<2x128xf32>
    %161 = vector.extract_strided_slice %160 {offsets = [0, 0], sizes = [2, 96], strides = [1, 1]} : vector<2x128xf32> to vector<2x96xf32>
    %162 = arith.negf %161 : vector<2x96xf32>
    %163 = math.exp %162 : vector<2x96xf32>
    %cst_40 = arith.constant 1.000000e+00 : f32
    %164 = vector.broadcast %cst_40 : f32 to vector<2x96xf32>
    %165 = arith.addf %164, %163 : vector<2x96xf32>
    %166 = arith.divf %164, %165 : vector<2x96xf32>
    %167 = vector.extract_strided_slice %166 {offsets = [0, 0], sizes = [2, 32], strides = [1, 1]} : vector<2x96xf32> to vector<2x32xf32>
    %168 = vector.extract_strided_slice %166 {offsets = [0, 32], sizes = [2, 32], strides = [1, 1]} : vector<2x96xf32> to vector<2x32xf32>
    %169 = vector.extract_strided_slice %166 {offsets = [0, 64], sizes = [2, 32], strides = [1, 1]} : vector<2x96xf32> to vector<2x32xf32>
    %170 = vector.extract_strided_slice %160 {offsets = [0, 96], sizes = [2, 32], strides = [1, 1]} : vector<2x128xf32> to vector<2x32xf32>
    %171 = math.tanh %170 : vector<2x32xf32>
    %172 = arith.mulf %168, %133 : vector<2x32xf32>
    %173 = arith.mulf %167, %171 : vector<2x32xf32>
    %174 = arith.addf %172, %173 : vector<2x32xf32>
    %175 = math.tanh %174 : vector<2x32xf32>
    %176 = arith.mulf %169, %175 : vector<2x32xf32>
    %c6 = arith.constant 6 : index
    %c0_41 = arith.constant 0 : index
    %177 = vector.load %arg12[%c6, %c0_41] : memref<16x32xf32, #tpu.memory_space<vmem>>, vector<2x32xf32>
    tpu.vector_store %arg12[%c6, %c0_41], %176 {strides = array<i32>} : memref<16x32xf32, #tpu.memory_space<vmem>>, vector<2x32xf32>,
    %178 = vector.extract_strided_slice %5 {offsets = [8, 0], sizes = [2, 128], strides = [1, 1]} : vector<16x128xf32> to vector<2x128xf32>
    %cst_42 = arith.constant dense<0.000000e+00> : vector<2x128xf32>
    %179 = tpu.matmul %155, %6, %cst_42 {dimension_numbers = #tpu.dot_dimension_numbers<[1], [0], [0], [1], [0, 0, 1, 1], [], []>} : vector<2x32xf32>, vector<32x128xf32>, vector<2x128xf32> -> vector<2x128xf32>
    %180 = arith.addf %178, %179 : vector<2x128xf32>
    %181 = vector.extract_strided_slice %180 {offsets = [0, 0], sizes = [2, 96], strides = [1, 1]} : vector<2x128xf32> to vector<2x96xf32>
    %182 = arith.negf %181 : vector<2x96xf32>
    %183 = math.exp %182 : vector<2x96xf32>
    %cst_43 = arith.constant 1.000000e+00 : f32
    %184 = vector.broadcast %cst_43 : f32 to vector<2x96xf32>
    %185 = arith.addf %184, %183 : vector<2x96xf32>
    %186 = arith.divf %184, %185 : vector<2x96xf32>
    %187 = vector.extract_strided_slice %186 {offsets = [0, 0], sizes = [2, 32], strides = [1, 1]} : vector<2x96xf32> to vector<2x32xf32>
    %188 = vector.extract_strided_slice %186 {offsets = [0, 32], sizes = [2, 32], strides = [1, 1]} : vector<2x96xf32> to vector<2x32xf32>
    %189 = vector.extract_strided_slice %186 {offsets = [0, 64], sizes = [2, 32], strides = [1, 1]} : vector<2x96xf32> to vector<2x32xf32>
    %190 = vector.extract_strided_slice %180 {offsets = [0, 96], sizes = [2, 32], strides = [1, 1]} : vector<2x128xf32> to vector<2x32xf32>
    %191 = math.tanh %190 : vector<2x32xf32>
    %192 = arith.mulf %188, %153 : vector<2x32xf32>
    %193 = arith.mulf %187, %191 : vector<2x32xf32>
    %194 = arith.addf %192, %193 : vector<2x32xf32>
    %195 = math.tanh %194 : vector<2x32xf32>
    %196 = arith.mulf %189, %195 : vector<2x32xf32>
    %cst_44 = arith.constant dense<0.000000e+00> : vector<2x128xf32>
    %197 = tpu.matmul %196, %7, %cst_44 {dimension_numbers = #tpu.dot_dimension_numbers<[1], [0], [0], [1], [0, 0, 1, 1], [], []>} : vector<2x32xf32>, vector<32x128xf32>, vector<2x128xf32> -> vector<2x128xf32>
    %cst_45 = arith.constant dense<0.000000e+00> : vector<2x128xf32>
    %198 = tpu.matmul %176, %8, %cst_45 {dimension_numbers = #tpu.dot_dimension_numbers<[1], [0], [0], [1], [0, 0, 1, 1], [], []>} : vector<2x32xf32>, vector<32x128xf32>, vector<2x128xf32> -> vector<2x128xf32>
    %199 = arith.addf %197, %198 : vector<2x128xf32>
    %200 = vector.broadcast %9 : vector<1x128xf32> to vector<2x128xf32>
    %201 = arith.addf %199, %200 : vector<2x128xf32>
    %202 = vector.extract_strided_slice %201 {offsets = [0, 0], sizes = [2, 96], strides = [1, 1]} : vector<2x128xf32> to vector<2x96xf32>
    %203 = arith.negf %202 : vector<2x96xf32>
    %204 = math.exp %203 : vector<2x96xf32>
    %cst_46 = arith.constant 1.000000e+00 : f32
    %205 = vector.broadcast %cst_46 : f32 to vector<2x96xf32>
    %206 = arith.addf %205, %204 : vector<2x96xf32>
    %207 = arith.divf %205, %206 : vector<2x96xf32>
    %208 = vector.extract_strided_slice %207 {offsets = [0, 0], sizes = [2, 32], strides = [1, 1]} : vector<2x96xf32> to vector<2x32xf32>
    %209 = vector.extract_strided_slice %207 {offsets = [0, 32], sizes = [2, 32], strides = [1, 1]} : vector<2x96xf32> to vector<2x32xf32>
    %210 = vector.extract_strided_slice %207 {offsets = [0, 64], sizes = [2, 32], strides = [1, 1]} : vector<2x96xf32> to vector<2x32xf32>
    %211 = vector.extract_strided_slice %201 {offsets = [0, 96], sizes = [2, 32], strides = [1, 1]} : vector<2x128xf32> to vector<2x32xf32>
    %212 = math.tanh %211 : vector<2x32xf32>
    %213 = arith.mulf %209, %174 : vector<2x32xf32>
    %214 = arith.mulf %208, %212 : vector<2x32xf32>
    %215 = arith.addf %213, %214 : vector<2x32xf32>
    %216 = math.tanh %215 : vector<2x32xf32>
    %217 = arith.mulf %210, %216 : vector<2x32xf32>
    %c8 = arith.constant 8 : index
    %c0_47 = arith.constant 0 : index
    %218 = vector.load %arg12[%c8, %c0_47] : memref<16x32xf32, #tpu.memory_space<vmem>>, vector<2x32xf32>
    tpu.vector_store %arg12[%c8, %c0_47], %217 {strides = array<i32>} : memref<16x32xf32, #tpu.memory_space<vmem>>, vector<2x32xf32>,
    %219 = vector.extract_strided_slice %5 {offsets = [10, 0], sizes = [2, 128], strides = [1, 1]} : vector<16x128xf32> to vector<2x128xf32>
    %cst_48 = arith.constant dense<0.000000e+00> : vector<2x128xf32>
    %220 = tpu.matmul %196, %6, %cst_48 {dimension_numbers = #tpu.dot_dimension_numbers<[1], [0], [0], [1], [0, 0, 1, 1], [], []>} : vector<2x32xf32>, vector<32x128xf32>, vector<2x128xf32> -> vector<2x128xf32>
    %221 = arith.addf %219, %220 : vector<2x128xf32>
    %222 = vector.extract_strided_slice %221 {offsets = [0, 0], sizes = [2, 96], strides = [1, 1]} : vector<2x128xf32> to vector<2x96xf32>
    %223 = arith.negf %222 : vector<2x96xf32>
    %224 = math.exp %223 : vector<2x96xf32>
    %cst_49 = arith.constant 1.000000e+00 : f32
    %225 = vector.broadcast %cst_49 : f32 to vector<2x96xf32>
    %226 = arith.addf %225, %224 : vector<2x96xf32>
    %227 = arith.divf %225, %226 : vector<2x96xf32>
    %228 = vector.extract_strided_slice %227 {offsets = [0, 0], sizes = [2, 32], strides = [1, 1]} : vector<2x96xf32> to vector<2x32xf32>
    %229 = vector.extract_strided_slice %227 {offsets = [0, 32], sizes = [2, 32], strides = [1, 1]} : vector<2x96xf32> to vector<2x32xf32>
    %230 = vector.extract_strided_slice %227 {offsets = [0, 64], sizes = [2, 32], strides = [1, 1]} : vector<2x96xf32> to vector<2x32xf32>
    %231 = vector.extract_strided_slice %221 {offsets = [0, 96], sizes = [2, 32], strides = [1, 1]} : vector<2x128xf32> to vector<2x32xf32>
    %232 = math.tanh %231 : vector<2x32xf32>
    %233 = arith.mulf %229, %194 : vector<2x32xf32>
    %234 = arith.mulf %228, %232 : vector<2x32xf32>
    %235 = arith.addf %233, %234 : vector<2x32xf32>
    %236 = math.tanh %235 : vector<2x32xf32>
    %237 = arith.mulf %230, %236 : vector<2x32xf32>
    %cst_50 = arith.constant dense<0.000000e+00> : vector<2x128xf32>
    %238 = tpu.matmul %237, %7, %cst_50 {dimension_numbers = #tpu.dot_dimension_numbers<[1], [0], [0], [1], [0, 0, 1, 1], [], []>} : vector<2x32xf32>, vector<32x128xf32>, vector<2x128xf32> -> vector<2x128xf32>
    %cst_51 = arith.constant dense<0.000000e+00> : vector<2x128xf32>
    %239 = tpu.matmul %217, %8, %cst_51 {dimension_numbers = #tpu.dot_dimension_numbers<[1], [0], [0], [1], [0, 0, 1, 1], [], []>} : vector<2x32xf32>, vector<32x128xf32>, vector<2x128xf32> -> vector<2x128xf32>
    %240 = arith.addf %238, %239 : vector<2x128xf32>
    %241 = vector.broadcast %9 : vector<1x128xf32> to vector<2x128xf32>
    %242 = arith.addf %240, %241 : vector<2x128xf32>
    %243 = vector.extract_strided_slice %242 {offsets = [0, 0], sizes = [2, 96], strides = [1, 1]} : vector<2x128xf32> to vector<2x96xf32>
    %244 = arith.negf %243 : vector<2x96xf32>
    %245 = math.exp %244 : vector<2x96xf32>
    %cst_52 = arith.constant 1.000000e+00 : f32
    %246 = vector.broadcast %cst_52 : f32 to vector<2x96xf32>
    %247 = arith.addf %246, %245 : vector<2x96xf32>
    %248 = arith.divf %246, %247 : vector<2x96xf32>
    %249 = vector.extract_strided_slice %248 {offsets = [0, 0], sizes = [2, 32], strides = [1, 1]} : vector<2x96xf32> to vector<2x32xf32>
    %250 = vector.extract_strided_slice %248 {offsets = [0, 32], sizes = [2, 32], strides = [1, 1]} : vector<2x96xf32> to vector<2x32xf32>
    %251 = vector.extract_strided_slice %248 {offsets = [0, 64], sizes = [2, 32], strides = [1, 1]} : vector<2x96xf32> to vector<2x32xf32>
    %252 = vector.extract_strided_slice %242 {offsets = [0, 96], sizes = [2, 32], strides = [1, 1]} : vector<2x128xf32> to vector<2x32xf32>
    %253 = math.tanh %252 : vector<2x32xf32>
    %254 = arith.mulf %250, %215 : vector<2x32xf32>
    %255 = arith.mulf %249, %253 : vector<2x32xf32>
    %256 = arith.addf %254, %255 : vector<2x32xf32>
    %257 = math.tanh %256 : vector<2x32xf32>
    %258 = arith.mulf %251, %257 : vector<2x32xf32>
    %c10 = arith.constant 10 : index
    %c0_53 = arith.constant 0 : index
    %259 = vector.load %arg12[%c10, %c0_53] : memref<16x32xf32, #tpu.memory_space<vmem>>, vector<2x32xf32>
    tpu.vector_store %arg12[%c10, %c0_53], %258 {strides = array<i32>} : memref<16x32xf32, #tpu.memory_space<vmem>>, vector<2x32xf32>,
    %260 = vector.extract_strided_slice %5 {offsets = [12, 0], sizes = [2, 128], strides = [1, 1]} : vector<16x128xf32> to vector<2x128xf32>
    %cst_54 = arith.constant dense<0.000000e+00> : vector<2x128xf32>
    %261 = tpu.matmul %237, %6, %cst_54 {dimension_numbers = #tpu.dot_dimension_numbers<[1], [0], [0], [1], [0, 0, 1, 1], [], []>} : vector<2x32xf32>, vector<32x128xf32>, vector<2x128xf32> -> vector<2x128xf32>
    %262 = arith.addf %260, %261 : vector<2x128xf32>
    %263 = vector.extract_strided_slice %262 {offsets = [0, 0], sizes = [2, 96], strides = [1, 1]} : vector<2x128xf32> to vector<2x96xf32>
    %264 = arith.negf %263 : vector<2x96xf32>
    %265 = math.exp %264 : vector<2x96xf32>
    %cst_55 = arith.constant 1.000000e+00 : f32
    %266 = vector.broadcast %cst_55 : f32 to vector<2x96xf32>
    %267 = arith.addf %266, %265 : vector<2x96xf32>
    %268 = arith.divf %266, %267 : vector<2x96xf32>
    %269 = vector.extract_strided_slice %268 {offsets = [0, 0], sizes = [2, 32], strides = [1, 1]} : vector<2x96xf32> to vector<2x32xf32>
    %270 = vector.extract_strided_slice %268 {offsets = [0, 32], sizes = [2, 32], strides = [1, 1]} : vector<2x96xf32> to vector<2x32xf32>
    %271 = vector.extract_strided_slice %268 {offsets = [0, 64], sizes = [2, 32], strides = [1, 1]} : vector<2x96xf32> to vector<2x32xf32>
    %272 = vector.extract_strided_slice %262 {offsets = [0, 96], sizes = [2, 32], strides = [1, 1]} : vector<2x128xf32> to vector<2x32xf32>
    %273 = math.tanh %272 : vector<2x32xf32>
    %274 = arith.mulf %270, %235 : vector<2x32xf32>
    %275 = arith.mulf %269, %273 : vector<2x32xf32>
    %276 = arith.addf %274, %275 : vector<2x32xf32>
    %277 = math.tanh %276 : vector<2x32xf32>
    %278 = arith.mulf %271, %277 : vector<2x32xf32>
    %cst_56 = arith.constant dense<0.000000e+00> : vector<2x128xf32>
    %279 = tpu.matmul %278, %7, %cst_56 {dimension_numbers = #tpu.dot_dimension_numbers<[1], [0], [0], [1], [0, 0, 1, 1], [], []>} : vector<2x32xf32>, vector<32x128xf32>, vector<2x128xf32> -> vector<2x128xf32>
    %cst_57 = arith.constant dense<0.000000e+00> : vector<2x128xf32>
    %280 = tpu.matmul %258, %8, %cst_57 {dimension_numbers = #tpu.dot_dimension_numbers<[1], [0], [0], [1], [0, 0, 1, 1], [], []>} : vector<2x32xf32>, vector<32x128xf32>, vector<2x128xf32> -> vector<2x128xf32>
    %281 = arith.addf %279, %280 : vector<2x128xf32>
    %282 = vector.broadcast %9 : vector<1x128xf32> to vector<2x128xf32>
    %283 = arith.addf %281, %282 : vector<2x128xf32>
    %284 = vector.extract_strided_slice %283 {offsets = [0, 0], sizes = [2, 96], strides = [1, 1]} : vector<2x128xf32> to vector<2x96xf32>
    %285 = arith.negf %284 : vector<2x96xf32>
    %286 = math.exp %285 : vector<2x96xf32>
    %cst_58 = arith.constant 1.000000e+00 : f32
    %287 = vector.broadcast %cst_58 : f32 to vector<2x96xf32>
    %288 = arith.addf %287, %286 : vector<2x96xf32>
    %289 = arith.divf %287, %288 : vector<2x96xf32>
    %290 = vector.extract_strided_slice %289 {offsets = [0, 0], sizes = [2, 32], strides = [1, 1]} : vector<2x96xf32> to vector<2x32xf32>
    %291 = vector.extract_strided_slice %289 {offsets = [0, 32], sizes = [2, 32], strides = [1, 1]} : vector<2x96xf32> to vector<2x32xf32>
    %292 = vector.extract_strided_slice %289 {offsets = [0, 64], sizes = [2, 32], strides = [1, 1]} : vector<2x96xf32> to vector<2x32xf32>
    %293 = vector.extract_strided_slice %283 {offsets = [0, 96], sizes = [2, 32], strides = [1, 1]} : vector<2x128xf32> to vector<2x32xf32>
    %294 = math.tanh %293 : vector<2x32xf32>
    %295 = arith.mulf %291, %256 : vector<2x32xf32>
    %296 = arith.mulf %290, %294 : vector<2x32xf32>
    %297 = arith.addf %295, %296 : vector<2x32xf32>
    %298 = math.tanh %297 : vector<2x32xf32>
    %299 = arith.mulf %292, %298 : vector<2x32xf32>
    %c12 = arith.constant 12 : index
    %c0_59 = arith.constant 0 : index
    %300 = vector.load %arg12[%c12, %c0_59] : memref<16x32xf32, #tpu.memory_space<vmem>>, vector<2x32xf32>
    tpu.vector_store %arg12[%c12, %c0_59], %299 {strides = array<i32>} : memref<16x32xf32, #tpu.memory_space<vmem>>, vector<2x32xf32>,
    %301 = vector.extract_strided_slice %5 {offsets = [14, 0], sizes = [2, 128], strides = [1, 1]} : vector<16x128xf32> to vector<2x128xf32>
    %cst_60 = arith.constant dense<0.000000e+00> : vector<2x128xf32>
    %302 = tpu.matmul %278, %6, %cst_60 {dimension_numbers = #tpu.dot_dimension_numbers<[1], [0], [0], [1], [0, 0, 1, 1], [], []>} : vector<2x32xf32>, vector<32x128xf32>, vector<2x128xf32> -> vector<2x128xf32>
    %303 = arith.addf %301, %302 : vector<2x128xf32>
    %304 = vector.extract_strided_slice %303 {offsets = [0, 0], sizes = [2, 96], strides = [1, 1]} : vector<2x128xf32> to vector<2x96xf32>
    %305 = arith.negf %304 : vector<2x96xf32>
    %306 = math.exp %305 : vector<2x96xf32>
    %cst_61 = arith.constant 1.000000e+00 : f32
    %307 = vector.broadcast %cst_61 : f32 to vector<2x96xf32>
    %308 = arith.addf %307, %306 : vector<2x96xf32>
    %309 = arith.divf %307, %308 : vector<2x96xf32>
    %310 = vector.extract_strided_slice %309 {offsets = [0, 0], sizes = [2, 32], strides = [1, 1]} : vector<2x96xf32> to vector<2x32xf32>
    %311 = vector.extract_strided_slice %309 {offsets = [0, 32], sizes = [2, 32], strides = [1, 1]} : vector<2x96xf32> to vector<2x32xf32>
    %312 = vector.extract_strided_slice %309 {offsets = [0, 64], sizes = [2, 32], strides = [1, 1]} : vector<2x96xf32> to vector<2x32xf32>
    %313 = vector.extract_strided_slice %303 {offsets = [0, 96], sizes = [2, 32], strides = [1, 1]} : vector<2x128xf32> to vector<2x32xf32>
    %314 = math.tanh %313 : vector<2x32xf32>
    %315 = arith.mulf %311, %276 : vector<2x32xf32>
    %316 = arith.mulf %310, %314 : vector<2x32xf32>
    %317 = arith.addf %315, %316 : vector<2x32xf32>
    %318 = math.tanh %317 : vector<2x32xf32>
    %319 = arith.mulf %312, %318 : vector<2x32xf32>
    %cst_62 = arith.constant dense<0.000000e+00> : vector<2x128xf32>
    %320 = tpu.matmul %319, %7, %cst_62 {dimension_numbers = #tpu.dot_dimension_numbers<[1], [0], [0], [1], [0, 0, 1, 1], [], []>} : vector<2x32xf32>, vector<32x128xf32>, vector<2x128xf32> -> vector<2x128xf32>
    %cst_63 = arith.constant dense<0.000000e+00> : vector<2x128xf32>
    %321 = tpu.matmul %299, %8, %cst_63 {dimension_numbers = #tpu.dot_dimension_numbers<[1], [0], [0], [1], [0, 0, 1, 1], [], []>} : vector<2x32xf32>, vector<32x128xf32>, vector<2x128xf32> -> vector<2x128xf32>
    %322 = arith.addf %320, %321 : vector<2x128xf32>
    %323 = vector.broadcast %9 : vector<1x128xf32> to vector<2x128xf32>
    %324 = arith.addf %322, %323 : vector<2x128xf32>
    %325 = vector.extract_strided_slice %324 {offsets = [0, 0], sizes = [2, 96], strides = [1, 1]} : vector<2x128xf32> to vector<2x96xf32>
    %326 = arith.negf %325 : vector<2x96xf32>
    %327 = math.exp %326 : vector<2x96xf32>
    %cst_64 = arith.constant 1.000000e+00 : f32
    %328 = vector.broadcast %cst_64 : f32 to vector<2x96xf32>
    %329 = arith.addf %328, %327 : vector<2x96xf32>
    %330 = arith.divf %328, %329 : vector<2x96xf32>
    %331 = vector.extract_strided_slice %330 {offsets = [0, 0], sizes = [2, 32], strides = [1, 1]} : vector<2x96xf32> to vector<2x32xf32>
    %332 = vector.extract_strided_slice %330 {offsets = [0, 32], sizes = [2, 32], strides = [1, 1]} : vector<2x96xf32> to vector<2x32xf32>
    %333 = vector.extract_strided_slice %330 {offsets = [0, 64], sizes = [2, 32], strides = [1, 1]} : vector<2x96xf32> to vector<2x32xf32>
    %334 = vector.extract_strided_slice %324 {offsets = [0, 96], sizes = [2, 32], strides = [1, 1]} : vector<2x128xf32> to vector<2x32xf32>
    %335 = math.tanh %334 : vector<2x32xf32>
    %336 = arith.mulf %332, %297 : vector<2x32xf32>
    %337 = arith.mulf %331, %335 : vector<2x32xf32>
    %338 = arith.addf %336, %337 : vector<2x32xf32>
    %339 = math.tanh %338 : vector<2x32xf32>
    %340 = arith.mulf %333, %339 : vector<2x32xf32>
    %c14 = arith.constant 14 : index
    %c0_65 = arith.constant 0 : index
    %341 = vector.load %arg12[%c14, %c0_65] : memref<16x32xf32, #tpu.memory_space<vmem>>, vector<2x32xf32>
    tpu.vector_store %arg12[%c14, %c0_65], %340 {strides = array<i32>} : memref<16x32xf32, #tpu.memory_space<vmem>>, vector<2x32xf32>,
    %c0_66 = arith.constant 0 : index
    %c0_67 = arith.constant 0 : index
    %342 = vector.load %arg12[%c0_66, %c0_67] : memref<16x32xf32, #tpu.memory_space<vmem>>, vector<16x32xf32>
    %cst_68 = arith.constant 0.000000e+00 : f32
    %343 = vector.broadcast %cst_68 : f32 to vector<16x32xf32>
    %344 = arith.maximumf %342, %343 : vector<16x32xf32>
    %c0_69 = arith.constant 0 : index
    %c0_70 = arith.constant 0 : index
    %345 = vector.load %arg7[%c0_69, %c0_70] : memref<32x16xf32, #tpu.memory_space<vmem>>, vector<32x16xf32>
    %cst_71 = arith.constant dense<0.000000e+00> : vector<16x16xf32>
    %346 = tpu.matmul %344, %345, %cst_71 {dimension_numbers = #tpu.dot_dimension_numbers<[1], [0], [0], [1], [0, 0, 1, 1], [], []>} : vector<16x32xf32>, vector<32x16xf32>, vector<16x16xf32> -> vector<16x16xf32>
    %c0_72 = arith.constant 0 : index
    %c0_73 = arith.constant 0 : index
    %347 = vector.load %arg8[%c0_72, %c0_73] : memref<1x16xf32, #tpu.memory_space<vmem>>, vector<1x16xf32>
    %348 = vector.broadcast %347 : vector<1x16xf32> to vector<16x16xf32>
    %349 = arith.addf %346, %348 : vector<16x16xf32>
    %c0_74 = arith.constant 0 : index
    %c0_75 = arith.constant 0 : index
    %350 = vector.load %arg9[%c0_74, %c0_75] : memref<2x16xf32, #tpu.memory_space<vmem>>, vector<2x16xf32>
    %cst_76 = arith.constant 0.000000e+00 : f32
    %351 = vector.broadcast %cst_76 : f32 to vector<16x16xf32>
    %352 = arith.maximumf %349, %351 : vector<16x16xf32>
    %cst_77 = arith.constant dense<0.000000e+00> : vector<2x16xf32>
    %353 = tpu.matmul %350, %352, %cst_77 {dimension_numbers = #tpu.dot_dimension_numbers<[1], [1], [0], [0], [0, 0, 1, 0], [], []>} : vector<2x16xf32>, vector<16x16xf32>, vector<2x16xf32> -> vector<2x16xf32>
    %c0_78 = arith.constant 0 : index
    %c0_79 = arith.constant 0 : index
    %354 = vector.load %arg10[%c0_78, %c0_79] : memref<2x1xf32, #tpu.memory_space<vmem>>, vector<2x1xf32>
    %355 = vector.broadcast %354 : vector<2x1xf32> to vector<2x16xf32>
    %356 = arith.addf %353, %355 : vector<2x16xf32>
    %357 = vector.extract_strided_slice %356 {offsets = [0, 0], sizes = [1, 16], strides = [1, 1]} : vector<2x16xf32> to vector<1x16xf32>
    %358 = vector.extract_strided_slice %356 {offsets = [1, 0], sizes = [1, 16], strides = [1, 1]} : vector<2x16xf32> to vector<1x16xf32>
    %359 = math.exp %358 : vector<1x16xf32>
    %360 = arith.mulf %357, %359 : vector<1x16xf32>
    %c0_80 = arith.constant 0 : index
    %c0_81 = arith.constant 0 : index
    %361 = vector.load %arg11[%c0_80, %c0_81] : memref<1x16xf32, #tpu.memory_space<vmem>>, vector<1x16xf32>
    tpu.vector_store %arg11[%c0_80, %c0_81], %360 {strides = array<i32>} : memref<1x16xf32, #tpu.memory_space<vmem>>, vector<1x16xf32>,
    return
  }
}

</mosaic_0001>

<bundles_post_ra>
// kernel: _lambda_.1
= control target key start
LH: loop header
LB: loop body
LE: loop exit
PB: predicated region body
PF: predicated region fallthrough
CT: control target
= control target key end

     0   :  { %vm55_vm0 = vcmask 1043456   ;;  %vm48_vm1 = vcmask 31744   ;;  %v3336_v0 = vmov 0.0|0.0   ;;  %vm3337_vm2 = vmmov 0   ;;  %s3339_s30 = smov 32   ;;  %s3814_s2 = inlined_call_operand.vmem [shape: f32[32,128], index: 2, kind: input, shape index: {}]   ;;  %s3815_s1 = inlined_call_operand.vmem [shape: f32[4,128], index: 1, kind: input, shape index: {}]   ;;  %s3816_s0 = inlined_call_operand.vmem [shape: f32[16,4], index: 0, kind: input, shape index: {}]   ;;  %s3817_s3 = inlined_call_operand.vmem [shape: f32[1,128], index: 3, kind: input, shape index: {}]   ;;  %s3818_s5 = inlined_call_operand.vmem [shape: f32[32,128], index: 5, kind: input, shape index: {}]   ;;  %s3819_s4 = inlined_call_operand.vmem [shape: f32[32,128], index: 4, kind: input, shape index: {}]   ;;  %s3820_s6 = inlined_call_operand.vmem [shape: f32[1,128], index: 6, kind: input, shape index: {}]   ;;  %s3821_s7 = inlined_call_operand.vmem [shape: f32[32,16], index: 7, kind: input, shape index: {}]   ;;  %s3822_s10 = inlined_call_operand.vmem [shape: f32[2,1], index: 10, kind: input, shape index: {}]   ;;  %s3823_s8 = inlined_call_operand.vmem [shape: f32[1,16], index: 8, kind: input, shape index: {}]   ;;  %s3824_s9 = inlined_call_operand.vmem [shape: f32[2,16], index: 9, kind: input, shape index: {}]   ;;  %s3825_s11 = inlined_call_operand.vmem [shape: f32[1,16], index: 11, kind: output, shape index: {}]  }
   0x1   :  { %3042 = vmatprep.subr.bf16.mxu1 %v3336_v0  ;;  %v134_v1 = vld [vmem:[%s3814_s2] sm:$0xff]  ;;  %v135_v2 = vld [vmem:[%s3814_s2 + $0x8] sm:$0xff]  ;;  %v136_v7 = vld [vmem:[%s3814_s2 + $0x10] sm:$0xff]  ;;  %v3338_v8 = vmov 0.0   ;;  %vm147_vm3 = vcmask 261120   ;;  %vm426_vm4 = vcmask 254976  }
   0x2   :  { %v40_v3 = vld [vmem:[%s3815_s1] sm:$0xf]  ;;  %v3412_v4 = vpack.c.bf16 %v135_v2, %v134_v1  ;;  %v39_v6 = vld [vmem:[%s3816_s0 + $0x8] sm:$0xff]  ;;  %2768 = vmatprep.mubr.msk.f32.mxu1 %vm3337_vm2, %v3338_v8  ;;  %v137_v9 = vld [vmem:[%s3814_s2 + $0x18] sm:$0xff]  ;;  %vm2482_vm5 = vcmask 130048   ;;  %vm2568_vm7 = vcmask 122880  }
   0x3   :  { %2755 = vmatprep.subr.msk.mxu0 %vm55_vm0, %v40_v3  ;;  %v38_v5 = vld [vmem:[%s3816_s0] sm:$0xff]  ;;  %v3433_v10 = vpack.c.bf16 %v137_v9, %v136_v7  ;;  %v143_v30 = vld [vmem:[%s3818_s5 + $0x8] sm:$0xff]  ;;  %v144_v31 = vld [vmem:[%s3818_s5 + $0x10] sm:$0xff] }
   0x4   :  { %2756 = vmatpush3.msk.msra.mxu0 %vm55_vm0, %v40_v3  ;;  %2757 = vmatprep.mubr.msk.f32.mxu0 %vm48_vm1, %v38_v5  ;;  %v2574_v11 = vld [vmem:[%s3817_s3] ss:$0 sm:$0xff]  ;;  %v145_v33 = vld [vmem:[%s3818_s5 + $0x18] sm:$0xff]  ;;  %v139_v35 = vld [vmem:[%s3819_s4 + $0x8] sm:$0xff] }
   0x5   :  { %3044 = vmatpush3.bf16.msra.mxu1 %v3412_v4  ;;  %2758 = vmatmul.mubr.msk.f32.vlgmr.msra.gmra.mrb[0].mxu0 %vm48_vm1, %v39_v6  ;;  %v142_v29 = vld [vmem:[%s3818_s5] sm:$0xff]  ;;  %v140_v37 = vld [vmem:[%s3819_s4 + $0x10] sm:$0xff]  ;;  %v141_v38 = vld [vmem:[%s3819_s4 + $0x18] sm:$0xff]  ;;  %v3486_v39 = vpack.c.bf16 %v145_v33, %v144_v31 }
   0x6   :  { %3045 = vmatprep.subr.bf16.mxu1 %v3336_v0  ;;  %3048 = vmatprep.subr.bf16.mxu0 %v3336_v0  ;;  %v3466_v32 = vpack.c.bf16 %v143_v30, %v142_v29  ;;  %v138_v34 = vld [vmem:[%s3819_s4] sm:$0xff]  ;;  %v3490_v40 = vpack.c.bf16 %v141_v38, %v140_v37  ;;  %s3340_s4 = smov 64   ;;  %vm3196_vm6 = vmpackc.low %vm2482_vm5, %vm2482_vm5 }
   0x7   :  { %2779 = vmatprep.mubr.msk.f32.mxu0 %vm3337_vm2, %v3338_v8  ;;  %v3477_v36 = vpack.c.bf16 %v139_v35, %v138_v34  ;;  %v3523_v47 = vld [vmem:[%s3820_s6] ss:$0 sm:$0xff] }
   0x8   :  { %3050 = vmatpush3.bf16.msra.mxu0 %v3466_v32 }
   0x9   :  { %3047 = vmatpush3.bf16.msra.mxu1 %v3433_v10  ;;  %3051 = vmatprep.subr.bf16.mxu0 %v3336_v0 }
   0xa   :  { %3054 = vmatprep.subr.bf16.mxu1 %v3336_v0 }
   0xc   :  { %2769 = vmatmul.mubr.f32.vlgmr.msra.gmra.mrb[0].mxu1 %v3338_v8  ;;  %3053 = vmatpush3.bf16.msra.mxu0 %v3486_v39 }
   0xd   :  { %2790 = vmatprep.mubr.msk.f32.mxu1 %vm3337_vm2, %v3338_v8  ;;  %3056 = vmatpush3.bf16.msra.mxu1 %v3477_v36 }
   0xe   :  { %3057 = vmatprep.subr.bf16.mxu1 %v3336_v0  ;;  %3060 = vmatprep.subr.bf16.mxu0 %v3336_v0 }
   0xf   :  { %2780 = vmatmul.mubr.f32.vlgmr.msra.gmra.mrb[2].mxu0 %v3338_v8 }
  0x10   :  { %3062 = vmatpush3.bf16.msra.mxu0 %v3412_v4  ;;  %2801 = vmatprep.mubr.msk.f32.mxu0 %vm3337_vm2, %v3338_v8 }
  0x11   :  { %3059 = vmatpush3.bf16.msra.mxu1 %v3490_v40  ;;  %3063 = vmatprep.subr.bf16.mxu0 %v3336_v0 }
  0x12   :  { %3066 = vmatprep.subr.bf16.mxu1 %v3336_v0 }
  0x14   :  { %3065 = vmatpush3.bf16.msra.mxu0 %v3433_v10 }
  0x15   :  { %3072 = vmatprep.subr.bf16.mxu0 %v3336_v0 }
  0xd8   :  { %v2759_v12 = vpop.f32.mrb[0].mxu0 }
  0xd9   :  { %v3447_v13 = vadd.f32 %v2759_v12, %v2574_v11  ;;  %v125_v14 = vpop.f32.mrb[1].mxu0 }
  0xda   :  { %v3449_v15 = vadd.f32 %v2574_v11, %v125_v14 }
  0xdf   :  { %v217_v16 = vpop.f32.mrb[0].mxu1 }
  0xe0   :  { %v221_v17 = vadd.f32 %v217_v16, %v3449_v15  ;;  %v2770_v18 = vpop.f32.mrb[1].mxu1 }
  0xe2   :  { %3205 = vtanh.f32 %v221_v17  ;;  %v2578_v20 = vmul.f32 -1.442695, %v221_v17  ;;  %v312_v44 = vpop.f32.mrb[2].mxu0 }
  0xe3   :  { %v2781_v45 = vpop.f32.mrb[3].mxu0 }
  0xe4   :  { %3207 = vpow2.f32 %v2578_v20 }
  0xec   :  { %v3206_v19 = vpop.eup %3205 }
  0xed   :  { %231 = vrot.lane.b32.xlu0 %v3206_v19, %s3339_s30 }
  0xee   :  { %v3208_v21 = vpop.eup %3207 }
  0xef   :  { %v225_v22 = vadd.f32 1.0, %v3208_v21 }
  0xf1   :  { %3209 = vrcp.f32 %v225_v22 }
  0xfb   :  { %v3210_v23 = vpop.eup %3209 }
  0xfc   :  { %v229_v26 = vmul.f32 0.0, %v3210_v23 }
 0x15f   :  { %v232_v24 = vpop.permute.xlu0 %231 }
 0x160   :  { %v234_v25 = vmul.f32 %v3210_v23, %v232_v24 }
 0x162   :  { %236 = vrot.lane.b32.xlu0 %v234_v25, %s3339_s30 }
 0x1d4   :  { %v237_v27 = vpop.permute.xlu0 %236 }
 0x1d5   :  { %v3454_v28 = vadd.f32 %v237_v27, %v229_v26 }
 0x1d7   :  { %3211 = vtanh.f32 %v3454_v28  ;;  %v510_v9 = vrot.slane %v3454_v28, 6 }
 0x1e1   :  { %v3212_v41 = vpop.eup %3211 }
 0x1e2   :  { %242 = vrot.lane.b32.xlu1 %v3212_v41, %s3339_s30 }
 0x254   :  { %v243_v42 = vpop.permute.xlu1 %242 }
 0x255   :  { %v245_v43 = vmul.f32 %v3210_v23, %v243_v42 }
 0x257   :  { %317 = vrot.lane.b32.xlu1 %v245_v43, %s3340_s4 }
 0x2c9   :  { %v318_v46 = vpop.permute.xlu1 %317 }
 0x2ca   :  { %2791 = vmatmul.mubr.msk.f32.vlgmr.msra.gmra.mrb[2].mxu1 %vm147_vm3, %v318_v46  ;;  %2802 = vmatmul.mubr.msk.f32.vlgmr.msra.gmra.mrb[4].mxu0 %vm147_vm3, %v318_v46 }
 0x2cb   :  { %3068 = vmatpush3.bf16.msra.mxu1 %v3466_v32  ;;  %3074 = vmatpush3.bf16.msra.mxu0 %v3477_v36 }
 0x2cc   :  { %3069 = vmatprep.subr.bf16.mxu1 %v3336_v0  ;;  %3075 = vmatprep.subr.bf16.mxu0 %v3336_v0 }
 0x2cd   :  { %2812 = vmatprep.mubr.msk.f32.mxu1 %vm3337_vm2, %v3338_v8  ;;  %2823 = vmatprep.mubr.msk.f32.mxu0 %vm3337_vm2, %v3338_v8 }
 0x2cf   :  { %3071 = vmatpush3.bf16.msra.mxu1 %v3486_v39  ;;  %3077 = vmatpush3.bf16.msra.mxu0 %v3490_v40 }
 0x2d0   :  { %3078 = vmatprep.subr.bf16.mxu1 %v3336_v0  ;;  %3084 = vmatprep.subr.bf16.mxu0 %v3336_v0 }
 0x39d   :  { %v387_v48 = vpop.f32.mrb[2].mxu1  ;;  %v494_v49 = vpop.f32.mrb[4].mxu0 }
 0x39e   :  { %v388_v50 = vadd.f32 %v387_v48, %v312_v44  ;;  %v499_v51 = vrot.slane %v494_v49, 6  ;;  %v2792_v52 = vpop.f32.mrb[3].mxu1  ;;  %v2803_v53 = vpop.f32.mrb[5].mxu0 }
 0x3a0   :  { %v397_v54 = vadd.f32 %v3523_v47, %v388_v50  ;;  %v501_v55 = vadd.f32 %v499_v51, %v3449_v15 }
 0x3a2   :  { %3213 = vtanh.f32 %v397_v54  ;;  %v2581_v58 = vmul.f32 -1.442695, %v397_v54  ;;  %v2583_v59 = vmul.f32 -1.442695, %v501_v55 }
 0x3a3   :  { %3215 = vtanh.f32 %v501_v55 }
 0x3a4   :  { %3217 = vpow2.f32 %v2581_v58 }
 0x3a5   :  { %3219 = vpow2.f32 %v2583_v59 }
 0x3ac   :  { %v3214_v56 = vpop.eup %3213 }
 0x3ad   :  { %v3216_v57 = vpop.eup %3215  ;;  %407 = vrot.lane.b32.xlu0 %v3214_v56, %s3339_s30 }
 0x3ae   :  { %514 = vrot.lane.b32.xlu1 %v3216_v57, %s3339_s30  ;;  %v3218_v60 = vpop.eup %3217 }
 0x3af   :  { %v3220_v61 = vpop.eup %3219  ;;  %v401_v62 = vadd.f32 1.0, %v3218_v60 }
 0x3b0   :  { %v505_v63 = vadd.f32 1.0, %v3220_v61 }
 0x3b1   :  { %3221 = vrcp.f32 %v401_v62 }
 0x3b2   :  { %3223 = vrcp.f32 %v505_v63 }
 0x3bb   :  { %v3222_v1 = vpop.eup %3221 }
 0x3bc   :  { %v3224_v3 = vpop.eup %3223  ;;  %v405_v11 = vmul.f32 0.0, %v3222_v1 }
 0x3bd   :  { %v512_v12 = vmul.f32 %v3224_v3, %v510_v9 }
 0x41f   :  { %v408_v2 = vpop.permute.xlu0 %407 }
 0x420   :  { %v515_v5 = vpop.permute.xlu1 %514  ;;  %v410_v6 = vmul.f32 %v3222_v1, %v408_v2 }
 0x421   :  { %v517_v7 = vmul.f32 %v3224_v3, %v515_v5 }
 0x422   :  { %412 = vrot.lane.b32.xlu0 %v410_v6, %s3339_s30 }
 0x423   :  { %519 = vrot.lane.b32.xlu1 %v517_v7, %s3339_s30 }
 0x494   :  { %v413_v14 = vpop.permute.xlu0 %412 }
 0x495   :  { %v520_v16 = vpop.permute.xlu1 %519  ;;  %v3532_v17 = vadd.f32 %v413_v14, %v405_v11 }
 0x496   :  { %v3534_v18 = vadd.f32 %v520_v16, %v512_v12 }
 0x497   :  { %3225 = vtanh.f32 %v3532_v17 }
 0x498   :  { %3227 = vtanh.f32 %v3534_v18  ;;  %v789_v60 = vrot.slane %v3534_v18, 6 }
 0x4a1   :  { %v3226_v19 = vpop.eup %3225 }
 0x4a2   :  { %v3228_v20 = vpop.eup %3227  ;;  %418 = vrot.lane.b32.xlu0 %v3226_v19, %s3339_s30 }
 0x4a3   :  { %525 = vrot.lane.b32.xlu1 %v3228_v20, %s3339_s30 }
 0x514   :  { %v419_v21 = vpop.permute.xlu0 %418 }
 0x515   :  { %v526_v22 = vpop.permute.xlu1 %525  ;;  %v421_v23 = vmul.f32 %v3222_v1, %v419_v21 }
 0x516   :  { %v528_v24 = vmul.f32 %v3224_v3, %v526_v22 }
 0x517   :  { %423 = vrot.lane.b32.xlu0 %v421_v23, %s3340_s4 }
 0x518   :  { %v602_v25 = vrot.slane %v528_v24, 2 }
 0x51a   :  { %603 = vrot.lane.b32.xlu1 %v602_v25, %s3340_s4 }
 0x589   :  { %v424_v26 = vpop.permute.xlu0 %423 }
 0x58a   :  { %427 = vst.msk [vmem:[#allocation2] sm:$0x3] %vm426_vm4, %v424_v26  ;;  %2813 = vmatmul.mubr.msk.f32.vlgmr.msra.gmra.mrb[4].mxu1 %vm147_vm3, %v424_v26 }
 0x58b   :  { %3080 = vmatpush3.bf16.msra.mxu1 %v3412_v4  ;;  %2834 = vmatprep.mubr.msk.f32.mxu1 %vm3337_vm2, %v3338_v8 }
 0x58c   :  { %v604_v27 = vpop.permute.xlu1 %603  ;;  %3081 = vmatprep.subr.bf16.mxu1 %v3336_v0 }
 0x58d   :  { %2824 = vmatmul.mubr.msk.f32.vlgmr.msra.gmra.mrb[6].mxu0 %vm147_vm3, %v604_v27 }
 0x58e   :  { %3086 = vmatpush3.bf16.msra.mxu0 %v3466_v32  ;;  %2845 = vmatprep.mubr.msk.f32.mxu0 %vm3337_vm2, %v3338_v8 }
 0x58f   :  { %3083 = vmatpush3.bf16.msra.mxu1 %v3433_v10  ;;  %3087 = vmatprep.subr.bf16.mxu0 %v3336_v0 }
 0x590   :  { %3090 = vmatprep.subr.bf16.mxu1 %v3336_v0 }
 0x592   :  { %2835 = vmatmul.mubr.msk.f32.vlgmr.msra.gmra.mrb[6].mxu1 %vm147_vm3, %v604_v27  ;;  %3089 = vmatpush3.bf16.msra.mxu0 %v3486_v39 }
 0x593   :  { %3096 = vmatprep.subr.bf16.mxu0 %v3336_v0  ;;  %3092 = vmatpush3.bf16.msra.mxu1 %v3477_v36 }
 0x594   :  { %3093 = vmatprep.subr.bf16.mxu1 %v3336_v0  ;;  %2856 = vmatprep.mubr.msk.f32.mxu1 %vm3337_vm2, %v3338_v8 }
 0x597   :  { %3095 = vmatpush3.bf16.msra.mxu1 %v3490_v40 }
 0x598   :  { %3102 = vmatprep.subr.bf16.mxu1 %v3336_v0 }
 0x65d   :  { %v597_v28 = vpop.f32.mrb[4].mxu1 }
 0x65e   :  { %v2814_v29 = vpop.f32.mrb[5].mxu1 }
 0x660   :  { %v673_v30 = vpop.f32.mrb[6].mxu0 }
 0x661   :  { %v674_v31 = vadd.f32 %v673_v30, %v597_v28  ;;  %v2825_v33 = vpop.f32.mrb[7].mxu0 }
 0x663   :  { %v677_v34 = vadd.f32 %v3523_v47, %v674_v31 }
 0x665   :  { %3229 = vtanh.f32 %v677_v34  ;;  %v773_v35 = vpop.f32.mrb[6].mxu1  ;;  %v2586_v44 = vmul.f32 -1.442695, %v677_v34 }
 0x666   :  { %v778_v37 = vrot.slane %v773_v35, 4  ;;  %v2836_v38 = vpop.f32.mrb[7].mxu1 }
 0x668   :  { %v780_v41 = vadd.f32 %v778_v37, %v3449_v15 }
 0x66a   :  { %3231 = vtanh.f32 %v780_v41  ;;  %v2588_v45 = vmul.f32 -1.442695, %v780_v41 }
 0x66b   :  { %3233 = vpow2.f32 %v2586_v44 }
 0x66c   :  { %3235 = vpow2.f32 %v2588_v45 }
 0x66f   :  { %v3230_v42 = vpop.eup %3229 }
 0x670   :  { %687 = vrot.lane.b32.xlu0 %v3230_v42, %s3339_s30 }
 0x674   :  { %v3232_v43 = vpop.eup %3231 }
 0x675   :  { %793 = vrot.lane.b32.xlu1 %v3232_v43, %s3339_s30  ;;  %v3234_v46 = vpop.eup %3233 }
 0x676   :  { %v681_v48 = vadd.f32 1.0, %v3234_v46  ;;  %v3236_v49 = vpop.eup %3235 }
 0x677   :  { %v784_v50 = vadd.f32 1.0, %v3236_v49 }
 0x678   :  { %3237 = vrcp.f32 %v681_v48 }
 0x679   :  { %3239 = vrcp.f32 %v784_v50 }
 0x682   :  { %v3238_v51 = vpop.eup %3237 }
 0x683   :  { %v3240_v54 = vpop.eup %3239  ;;  %v685_v57 = vmul.f32 %v3238_v51, %v3532_v17 }
 0x684   :  { %v791_v61 = vmul.f32 %v3240_v54, %v789_v60 }
 0x6e2   :  { %v688_v52 = vpop.permute.xlu0 %687 }
 0x6e3   :  { %v690_v53 = vmul.f32 %v3238_v51, %v688_v52 }
 0x6e5   :  { %692 = vrot.lane.b32.xlu0 %v690_v53, %s3339_s30 }
 0x6e7   :  { %v794_v55 = vpop.permute.xlu1 %793 }
 0x6e8   :  { %v796_v56 = vmul.f32 %v3240_v54, %v794_v55 }
 0x6ea   :  { %798 = vrot.lane.b32.xlu1 %v796_v56, %s3339_s30 }
 0x757   :  { %v693_v58 = vpop.permute.xlu0 %692 }
 0x758   :  { %v3571_v59 = vadd.f32 %v693_v58, %v685_v57 }
 0x75a   :  { %3241 = vtanh.f32 %v3571_v59 }
 0x75c   :  { %v799_v62 = vpop.permute.xlu1 %798 }
 0x75d   :  { %v3575_v63 = vadd.f32 %v799_v62, %v791_v61 }
 0x75f   :  { %3243 = vtanh.f32 %v3575_v63  ;;  %v1068_v42 = vrot.slane %v3575_v63, 6 }
 0x764   :  { %v3242_v1 = vpop.eup %3241 }
 0x765   :  { %698 = vrot.lane.b32.xlu0 %v3242_v1, %s3339_s30 }
 0x769   :  { %v3244_v2 = vpop.eup %3243 }
 0x76a   :  { %804 = vrot.lane.b32.xlu1 %v3244_v2, %s3339_s30 }
 0x7d7   :  { %v699_v3 = vpop.permute.xlu0 %698 }
 0x7d8   :  { %v701_v5 = vmul.f32 %v3238_v51, %v699_v3 }
 0x7da   :  { %703 = vrot.lane.b32.xlu0 %v701_v5, %s3340_s4 }
 0x7dc   :  { %v805_v6 = vpop.permute.xlu1 %804 }
 0x7dd   :  { %v807_v7 = vmul.f32 %v3240_v54, %v805_v6 }
 0x7df   :  { %v881_v9 = vrot.slane %v807_v7, 4 }
 0x7e1   :  { %882 = vrot.lane.b32.xlu1 %v881_v9, %s3340_s4 }
 0x84c   :  { %v704_v11 = vpop.permute.xlu0 %703 }
 0x84d   :  { %706 = vst.msk [vmem:[#allocation2 + $0x2] sm:$0x3] %vm426_vm4, %v704_v11  ;;  %2846 = vmatmul.mubr.msk.f32.vlgmr.msra.gmra.mrb[8].mxu0 %vm147_vm3, %v704_v11 }
 0x84e   :  { %3098 = vmatpush3.bf16.msra.mxu0 %v3412_v4  ;;  %2867 = vmatprep.mubr.msk.f32.mxu0 %vm3337_vm2, %v3338_v8 }
 0x84f   :  { %3099 = vmatprep.subr.bf16.mxu0 %v3336_v0 }
 0x852   :  { %3101 = vmatpush3.bf16.msra.mxu0 %v3433_v10 }
 0x853   :  { %v883_v12 = vpop.permute.xlu1 %882  ;;  %3108 = vmatprep.subr.bf16.mxu0 %v3336_v0 }
 0x854   :  { %2857 = vmatmul.mubr.msk.f32.vlgmr.msra.gmra.mrb[8].mxu1 %vm147_vm3, %v883_v12 }
 0x855   :  { %2868 = vmatmul.mubr.msk.f32.vlgmr.msra.gmra.mrb[10].mxu0 %vm147_vm3, %v883_v12  ;;  %3104 = vmatpush3.bf16.msra.mxu1 %v3466_v32 }
 0x856   :  { %3105 = vmatprep.subr.bf16.mxu1 %v3336_v0  ;;  %3110 = vmatpush3.bf16.msra.mxu0 %v3477_v36 }
 0x857   :  { %3111 = vmatprep.subr.bf16.mxu0 %v3336_v0  ;;  %2878 = vmatprep.mubr.msk.f32.mxu1 %vm3337_vm2, %v3338_v8 }
 0x858   :  { %2889 = vmatprep.mubr.msk.f32.mxu0 %vm3337_vm2, %v3338_v8 }
 0x859   :  { %3107 = vmatpush3.bf16.msra.mxu1 %v3486_v39 }
 0x85a   :  { %3113 = vmatpush3.bf16.msra.mxu0 %v3490_v40  ;;  %3114 = vmatprep.subr.bf16.mxu1 %v3336_v0 }
 0x85b   :  { %3120 = vmatprep.subr.bf16.mxu0 %v3336_v0 }
 0x920   :  { %v876_v14 = vpop.f32.mrb[8].mxu0 }
 0x921   :  { %v2847_v16 = vpop.f32.mrb[9].mxu0 }
 0x927   :  { %v952_v17 = vpop.f32.mrb[8].mxu1 }
 0x928   :  { %v953_v18 = vadd.f32 %v952_v17, %v876_v14  ;;  %v1052_v19 = vpop.f32.mrb[10].mxu0  ;;  %v2858_v20 = vpop.f32.mrb[9].mxu1 }
 0x929   :  { %v1057_v21 = vrot.slane %v1052_v19, 2  ;;  %v2869_v22 = vpop.f32.mrb[11].mxu0 }
 0x92a   :  { %v956_v23 = vadd.f32 %v3523_v47, %v953_v18 }
 0x92b   :  { %v1059_v24 = vadd.f32 %v1057_v21, %v3449_v15 }
 0x92c   :  { %3245 = vtanh.f32 %v956_v23  ;;  %v2591_v27 = vmul.f32 -1.442695, %v956_v23 }
 0x92d   :  { %3247 = vtanh.f32 %v1059_v24  ;;  %v2593_v28 = vmul.f32 -1.442695, %v1059_v24 }
 0x92e   :  { %3249 = vpow2.f32 %v2591_v27 }
 0x92f   :  { %3251 = vpow2.f32 %v2593_v28 }
 0x936   :  { %v3246_v25 = vpop.eup %3245 }
 0x937   :  { %v3248_v26 = vpop.eup %3247  ;;  %966 = vrot.lane.b32.xlu1 %v3246_v25, %s3339_s30 }
 0x938   :  { %1072 = vrot.lane.b32.xlu0 %v3248_v26, %s3339_s30  ;;  %v3250_v29 = vpop.eup %3249 }
 0x939   :  { %v3252_v30 = vpop.eup %3251  ;;  %v960_v31 = vadd.f32 1.0, %v3250_v29 }
 0x93a   :  { %v1063_v33 = vadd.f32 1.0, %v3252_v30 }
 0x93b   :  { %3253 = vrcp.f32 %v960_v31 }
 0x93c   :  { %3255 = vrcp.f32 %v1063_v33 }
 0x945   :  { %v3254_v34 = vpop.eup %3253 }
 0x946   :  { %v3256_v35 = vpop.eup %3255  ;;  %v964_v43 = vmul.f32 %v3254_v34, %v3571_v59 }
 0x947   :  { %v1070_v44 = vmul.f32 %v3256_v35, %v1068_v42 }
 0x9a9   :  { %v967_v15 = vpop.permute.xlu1 %966 }
 0x9aa   :  { %v1073_v37 = vpop.permute.xlu0 %1072  ;;  %v969_v38 = vmul.f32 %v3254_v34, %v967_v15 }
 0x9ab   :  { %v1075_v41 = vmul.f32 %v3256_v35, %v1073_v37 }
 0x9ac   :  { %971 = vrot.lane.b32.xlu1 %v969_v38, %s3339_s30 }
 0x9ad   :  { %1077 = vrot.lane.b32.xlu0 %v1075_v41, %s3339_s30 }
 0xa1e   :  { %v972_v45 = vpop.permute.xlu1 %971 }
 0xa1f   :  { %v1078_v46 = vpop.permute.xlu0 %1077  ;;  %v3612_v48 = vadd.f32 %v972_v45, %v964_v43 }
 0xa20   :  { %v3614_v49 = vadd.f32 %v1078_v46, %v1070_v44 }
 0xa21   :  { %3257 = vtanh.f32 %v3612_v48 }
 0xa22   :  { %3259 = vtanh.f32 %v3614_v49  ;;  %v1344_v25 = vrot.slane %v3614_v49, 6 }
 0xa2b   :  { %v3258_v50 = vpop.eup %3257 }
 0xa2c   :  { %v3260_v51 = vpop.eup %3259  ;;  %977 = vrot.lane.b32.xlu1 %v3258_v50, %s3339_s30 }
 0xa2d   :  { %1083 = vrot.lane.b32.xlu0 %v3260_v51, %s3339_s30 }
 0xa9e   :  { %v978_v52 = vpop.permute.xlu1 %977 }
 0xa9f   :  { %v1084_v53 = vpop.permute.xlu0 %1083  ;;  %v980_v54 = vmul.f32 %v3254_v34, %v978_v52 }
 0xaa0   :  { %v1086_v55 = vmul.f32 %v3256_v35, %v1084_v53 }
 0xaa1   :  { %982 = vrot.lane.b32.xlu0 %v980_v54, %s3340_s4 }
 0xaa2   :  { %v1160_v56 = vrot.slane %v1086_v55, 6 }
 0xaa4   :  { %1161 = vrot.lane.b32.xlu1 %v1160_v56, %s3340_s4 }
 0xb13   :  { %v983_v57 = vpop.permute.xlu0 %982 }
 0xb14   :  { %985 = vst.msk [vmem:[#allocation2 + $0x4] sm:$0x3] %vm426_vm4, %v983_v57  ;;  %2879 = vmatmul.mubr.msk.f32.vlgmr.msra.gmra.mrb[10].mxu1 %vm147_vm3, %v983_v57 }
 0xb15   :  { %3116 = vmatpush3.bf16.msra.mxu1 %v3412_v4  ;;  %2900 = vmatprep.mubr.msk.f32.mxu1 %vm3337_vm2, %v3338_v8 }
 0xb16   :  { %v1162_v58 = vpop.permute.xlu1 %1161  ;;  %3117 = vmatprep.subr.bf16.mxu1 %v3336_v0 }
 0xb17   :  { %2890 = vmatmul.mubr.msk.f32.vlgmr.msra.gmra.mrb[12].mxu0 %vm147_vm3, %v1162_v58 }
 0xb18   :  { %3122 = vmatpush3.bf16.msra.mxu0 %v3466_v32  ;;  %2911 = vmatprep.mubr.msk.f32.mxu0 %vm3337_vm2, %v3338_v8 }
 0xb19   :  { %3119 = vmatpush3.bf16.msra.mxu1 %v3433_v10  ;;  %3123 = vmatprep.subr.bf16.mxu0 %v3336_v0 }
 0xb1a   :  { %3126 = vmatprep.subr.bf16.mxu1 %v3336_v0 }
 0xb1c   :  { %2901 = vmatmul.mubr.msk.f32.vlgmr.msra.gmra.mrb[12].mxu1 %vm147_vm3, %v1162_v58  ;;  %3125 = vmatpush3.bf16.msra.mxu0 %v3486_v39 }
 0xb1d   :  { %3128 = vmatpush3.bf16.msra.mxu1 %v3477_v36  ;;  %3132 = vmatprep.subr.bf16.mxu0 %v3336_v0 }
 0xb1e   :  { %3129 = vmatprep.subr.bf16.mxu1 %v3336_v0  ;;  %2922 = vmatprep.mubr.msk.f32.mxu1 %vm3337_vm2, %v3338_v8 }
 0xb21   :  { %3131 = vmatpush3.bf16.msra.mxu1 %v3490_v40 }
 0xb22   :  { %3138 = vmatprep.subr.bf16.mxu1 %v3336_v0 }
 0xbe7   :  { %v1155_v59 = vpop.f32.mrb[10].mxu1 }
 0xbe8   :  { %v2880_v60 = vpop.f32.mrb[11].mxu1 }
 0xbea   :  { %v1231_v61 = vpop.f32.mrb[12].mxu0 }
 0xbeb   :  { %v1232_v62 = vadd.f32 %v1231_v61, %v1155_v59  ;;  %v2891_v63 = vpop.f32.mrb[13].mxu0 }
 0xbed   :  { %v1235_v1 = vadd.f32 %v3523_v47, %v1232_v62 }
 0xbef   :  { %3261 = vtanh.f32 %v1235_v1  ;;  %v1331_v2 = vpop.f32.mrb[12].mxu1  ;;  %v2596_v9 = vmul.f32 -1.442695, %v1235_v1 }
 0xbf0   :  { %v1335_v3 = vadd.f32 %v1331_v2, %v3447_v13  ;;  %v2902_v5 = vpop.f32.mrb[13].mxu1 }
 0xbf2   :  { %3263 = vtanh.f32 %v1335_v3  ;;  %v2598_v11 = vmul.f32 -1.442695, %v1335_v3 }
 0xbf3   :  { %3265 = vpow2.f32 %v2596_v9 }
 0xbf4   :  { %3267 = vpow2.f32 %v2598_v11 }
 0xbf9   :  { %v3262_v6 = vpop.eup %3261 }
 0xbfa   :  { %1245 = vrot.lane.b32.xlu0 %v3262_v6, %s3339_s30 }
 0xbfc   :  { %v3264_v7 = vpop.eup %3263 }
 0xbfd   :  { %1348 = vrot.lane.b32.xlu1 %v3264_v7, %s3339_s30  ;;  %v3266_v12 = vpop.eup %3265 }
 0xbfe   :  { %v3268_v14 = vpop.eup %3267  ;;  %v1239_v16 = vadd.f32 1.0, %v3266_v12 }
 0xbff   :  { %v1339_v17 = vadd.f32 1.0, %v3268_v14 }
 0xc00   :  { %3269 = vrcp.f32 %v1239_v16 }
 0xc01   :  { %3271 = vrcp.f32 %v1339_v17 }
 0xc0a   :  { %v3270_v18 = vpop.eup %3269 }
 0xc0b   :  { %v3272_v21 = vpop.eup %3271  ;;  %v1243_v24 = vmul.f32 %v3270_v18, %v3612_v48 }
 0xc0c   :  { %v1346_v28 = vmul.f32 %v3272_v21, %v1344_v25 }
 0xc6c   :  { %v1246_v19 = vpop.permute.xlu0 %1245 }
 0xc6d   :  { %v1248_v20 = vmul.f32 %v3270_v18, %v1246_v19 }
 0xc6f   :  { %1250 = vrot.lane.b32.xlu0 %v1248_v20, %s3339_s30  ;;  %v1349_v22 = vpop.permute.xlu1 %1348 }
 0xc70   :  { %v1351_v23 = vmul.f32 %v3272_v21, %v1349_v22 }
 0xc72   :  { %1353 = vrot.lane.b32.xlu1 %v1351_v23, %s3339_s30 }
 0xce1   :  { %v1251_v26 = vpop.permute.xlu0 %1250 }
 0xce2   :  { %v3652_v27 = vadd.f32 %v1251_v26, %v1243_v24 }
 0xce4   :  { %3273 = vtanh.f32 %v3652_v27  ;;  %v1354_v29 = vpop.permute.xlu1 %1353 }
 0xce5   :  { %v3655_v30 = vadd.f32 %v1354_v29, %v1346_v28 }
 0xce7   :  { %3275 = vtanh.f32 %v3655_v30  ;;  %v1622_v9 = vrot.slane %v3655_v30, 6 }
 0xcee   :  { %v3274_v31 = vpop.eup %3273 }
 0xcef   :  { %1256 = vrot.lane.b32.xlu0 %v3274_v31, %s3339_s30 }
 0xcf1   :  { %v3276_v33 = vpop.eup %3275 }
 0xcf2   :  { %1359 = vrot.lane.b32.xlu1 %v3276_v33, %s3339_s30 }
 0xd61   :  { %v1257_v34 = vpop.permute.xlu0 %1256 }
 0xd62   :  { %v1259_v15 = vmul.f32 %v3270_v18, %v1257_v34 }
 0xd64   :  { %1261 = vrot.lane.b32.xlu0 %v1259_v15, %s3340_s4  ;;  %v1360_v35 = vpop.permute.xlu1 %1359 }
 0xd65   :  { %v1362_v37 = vmul.f32 %v3272_v21, %v1360_v35 }
 0xd67   :  { %1436 = vrot.lane.b32.xlu1 %v1362_v37, %s3340_s4 }
 0xdd6   :  { %v1262_v38 = vpop.permute.xlu0 %1261 }
 0xdd7   :  { %1264 = vst.msk [vmem:[#allocation2 + $0x6] sm:$0x3] %vm426_vm4, %v1262_v38  ;;  %2912 = vmatmul.mubr.msk.f32.vlgmr.msra.gmra.mrb[14].mxu0 %vm147_vm3, %v1262_v38 }
 0xdd8   :  { %3134 = vmatpush3.bf16.msra.mxu0 %v3412_v4  ;;  %2933 = vmatprep.mubr.msk.f32.mxu0 %vm3337_vm2, %v3338_v8 }
 0xdd9   :  { %v1437_v41 = vpop.permute.xlu1 %1436  ;;  %3135 = vmatprep.subr.bf16.mxu0 %v3336_v0 }
 0xdda   :  { %2923 = vmatmul.mubr.msk.f32.vlgmr.msra.gmra.mrb[14].mxu1 %vm147_vm3, %v1437_v41 }
 0xddb   :  { %3140 = vmatpush3.bf16.msra.mxu1 %v3466_v32  ;;  %2944 = vmatprep.mubr.msk.f32.mxu1 %vm3337_vm2, %v3338_v8 }
 0xddc   :  { %3137 = vmatpush3.bf16.msra.mxu0 %v3433_v10  ;;  %3141 = vmatprep.subr.bf16.mxu1 %v3336_v0 }
 0xddd   :  { %3144 = vmatprep.subr.bf16.mxu0 %v3336_v0 }
 0xddf   :  { %2934 = vmatmul.mubr.msk.f32.vlgmr.msra.gmra.mrb[16].mxu0 %vm147_vm3, %v1437_v41  ;;  %3143 = vmatpush3.bf16.msra.mxu1 %v3486_v39 }
 0xde0   :  { %3146 = vmatpush3.bf16.msra.mxu0 %v3477_v36  ;;  %3150 = vmatprep.subr.bf16.mxu1 %v3336_v0 }
 0xde1   :  { %3147 = vmatprep.subr.bf16.mxu0 %v3336_v0  ;;  %2955 = vmatprep.mubr.msk.f32.mxu0 %vm3337_vm2, %v3338_v8 }
 0xde4   :  { %3149 = vmatpush3.bf16.msra.mxu0 %v3490_v40 }
 0xde5   :  { %3156 = vmatprep.subr.bf16.mxu0 %v3336_v0 }
 0xeaa   :  { %v1431_v42 = vpop.f32.mrb[14].mxu0 }
 0xeab   :  { %v2913_v43 = vpop.f32.mrb[15].mxu0 }
 0xead   :  { %v1506_v44 = vpop.f32.mrb[14].mxu1 }
 0xeae   :  { %v1507_v45 = vadd.f32 %v1506_v44, %v1431_v42  ;;  %v2924_v46 = vpop.f32.mrb[15].mxu1 }
 0xeb0   :  { %v1510_v48 = vadd.f32 %v3523_v47, %v1507_v45 }
 0xeb2   :  { %3277 = vtanh.f32 %v1510_v48  ;;  %v1606_v49 = vpop.f32.mrb[16].mxu0  ;;  %v2601_v55 = vmul.f32 -1.442695, %v1510_v48 }
 0xeb3   :  { %v1611_v50 = vrot.slane %v1606_v49, 6  ;;  %v2935_v51 = vpop.f32.mrb[17].mxu0 }
 0xeb5   :  { %v1613_v52 = vadd.f32 %v1611_v50, %v3447_v13 }
 0xeb7   :  { %3279 = vtanh.f32 %v1613_v52  ;;  %v2603_v56 = vmul.f32 -1.442695, %v1613_v52 }
 0xeb8   :  { %3281 = vpow2.f32 %v2601_v55 }
 0xeb9   :  { %3283 = vpow2.f32 %v2603_v56 }
 0xebc   :  { %v3278_v53 = vpop.eup %3277 }
 0xebd   :  { %1520 = vrot.lane.b32.xlu0 %v3278_v53, %s3339_s30 }
 0xec1   :  { %v3280_v54 = vpop.eup %3279 }
 0xec2   :  { %1626 = vrot.lane.b32.xlu1 %v3280_v54, %s3339_s30  ;;  %v3282_v57 = vpop.eup %3281 }
 0xec3   :  { %v1514_v58 = vadd.f32 1.0, %v3282_v57  ;;  %v3284_v59 = vpop.eup %3283 }
 0xec4   :  { %v1617_v60 = vadd.f32 1.0, %v3284_v59 }
 0xec5   :  { %3285 = vrcp.f32 %v1514_v58 }
 0xec6   :  { %3287 = vrcp.f32 %v1617_v60 }
 0xecf   :  { %v3286_v61 = vpop.eup %3285 }
 0xed0   :  { %v3288_v1 = vpop.eup %3287  ;;  %v1518_v5 = vmul.f32 %v3286_v61, %v3652_v27 }
 0xed1   :  { %v1624_v11 = vmul.f32 %v3288_v1, %v1622_v9 }
 0xf2f   :  { %v1521_v62 = vpop.permute.xlu0 %1520 }
 0xf30   :  { %v1523_v63 = vmul.f32 %v3286_v61, %v1521_v62 }
 0xf32   :  { %1525 = vrot.lane.b32.xlu0 %v1523_v63, %s3339_s30 }
 0xf34   :  { %v1627_v2 = vpop.permute.xlu1 %1626 }
 0xf35   :  { %v1629_v3 = vmul.f32 %v3288_v1, %v1627_v2 }
 0xf37   :  { %1631 = vrot.lane.b32.xlu1 %v1629_v3, %s3339_s30 }
 0xfa4   :  { %v1526_v6 = vpop.permute.xlu0 %1525 }
 0xfa5   :  { %v3691_v7 = vadd.f32 %v1526_v6, %v1518_v5 }
 0xfa7   :  { %3289 = vtanh.f32 %v3691_v7 }
 0xfa9   :  { %v1632_v12 = vpop.permute.xlu1 %1631 }
 0xfaa   :  { %v3695_v14 = vadd.f32 %v1632_v12, %v1624_v11 }
 0xfac   :  { %3291 = vtanh.f32 %v3695_v14  ;;  %v1901_v53 = vrot.slane %v3695_v14, 6 }
 0xfb1   :  { %v3290_v16 = vpop.eup %3289 }
 0xfb2   :  { %1531 = vrot.lane.b32.xlu0 %v3290_v16, %s3339_s30 }
 0xfb6   :  { %v3292_v17 = vpop.eup %3291 }
 0xfb7   :  { %1637 = vrot.lane.b32.xlu1 %v3292_v17, %s3339_s30 }
0x1024   :  { %v1532_v18 = vpop.permute.xlu0 %1531 }
0x1025   :  { %v1534_v19 = vmul.f32 %v3286_v61, %v1532_v18 }
0x1027   :  { %1536 = vrot.lane.b32.xlu0 %v1534_v19, %s3340_s4 }
0x1029   :  { %v1638_v20 = vpop.permute.xlu1 %1637 }
0x102a   :  { %v1640_v21 = vmul.f32 %v3288_v1, %v1638_v20 }
0x102c   :  { %v1714_v22 = vrot.slane %v1640_v21, 2 }
0x102e   :  { %1715 = vrot.lane.b32.xlu1 %v1714_v22, %s3340_s4 }
0x1099   :  { %v1537_v23 = vpop.permute.xlu0 %1536 }
0x109a   :  { %1539 = vst.msk [vmem:[#allocation2 + $0x8] sm:$0x3] %vm426_vm4, %v1537_v23  ;;  %2945 = vmatmul.mubr.msk.f32.vlgmr.msra.gmra.mrb[16].mxu1 %vm147_vm3, %v1537_v23 }
0x109b   :  { %3152 = vmatpush3.bf16.msra.mxu1 %v3412_v4  ;;  %2966 = vmatprep.mubr.msk.f32.mxu1 %vm3337_vm2, %v3338_v8 }
0x109c   :  { %3153 = vmatprep.subr.bf16.mxu1 %v3336_v0 }
0x109f   :  { %3155 = vmatpush3.bf16.msra.mxu1 %v3433_v10 }
0x10a0   :  { %v1716_v24 = vpop.permute.xlu1 %1715  ;;  %3162 = vmatprep.subr.bf16.mxu1 %v3336_v0 }
0x10a1   :  { %2956 = vmatmul.mubr.msk.f32.vlgmr.msra.gmra.mrb[18].mxu0 %vm147_vm3, %v1716_v24 }
0x10a2   :  { %2967 = vmatmul.mubr.msk.f32.vlgmr.msra.gmra.mrb[18].mxu1 %vm147_vm3, %v1716_v24  ;;  %3158 = vmatpush3.bf16.msra.mxu0 %v3466_v32 }
0x10a3   :  { %3159 = vmatprep.subr.bf16.mxu0 %v3336_v0  ;;  %3164 = vmatpush3.bf16.msra.mxu1 %v3477_v36 }
0x10a4   :  { %2977 = vmatprep.mubr.msk.f32.mxu0 %vm3337_vm2, %v3338_v8  ;;  %3165 = vmatprep.subr.bf16.mxu1 %v3336_v0 }
0x10a5   :  { %2988 = vmatprep.mubr.msk.f32.mxu1 %vm3337_vm2, %v3338_v8 }
0x10a6   :  { %3161 = vmatpush3.bf16.msra.mxu0 %v3486_v39 }
0x10a7   :  { %3168 = vmatprep.subr.bf16.mxu0 %v3336_v0  ;;  %3167 = vmatpush3.bf16.msra.mxu1 %v3490_v40 }
0x10a8   :  { %3174 = vmatprep.subr.bf16.mxu1 %v3336_v0 }
0x116d   :  { %v1709_v25 = vpop.f32.mrb[16].mxu1 }
0x116e   :  { %v2946_v26 = vpop.f32.mrb[17].mxu1 }
0x1174   :  { %v1785_v27 = vpop.f32.mrb[18].mxu0 }
0x1175   :  { %v1786_v28 = vadd.f32 %v1785_v27, %v1709_v25  ;;  %v2957_v29 = vpop.f32.mrb[19].mxu0  ;;  %v1885_v30 = vpop.f32.mrb[18].mxu1 }
0x1176   :  { %v1890_v31 = vrot.slane %v1885_v30, 4  ;;  %v2968_v33 = vpop.f32.mrb[19].mxu1 }
0x1177   :  { %v1789_v34 = vadd.f32 %v3523_v47, %v1786_v28 }
0x1178   :  { %v1892_v15 = vadd.f32 %v1890_v31, %v3447_v13 }
0x1179   :  { %3293 = vtanh.f32 %v1789_v34  ;;  %v2606_v38 = vmul.f32 -1.442695, %v1789_v34 }
0x117a   :  { %3295 = vtanh.f32 %v1892_v15  ;;  %v2608_v41 = vmul.f32 -1.442695, %v1892_v15 }
0x117b   :  { %3297 = vpow2.f32 %v2606_v38 }
0x117c   :  { %3299 = vpow2.f32 %v2608_v41 }
0x1183   :  { %v3294_v35 = vpop.eup %3293 }
0x1184   :  { %v3296_v37 = vpop.eup %3295  ;;  %1799 = vrot.lane.b32.xlu0 %v3294_v35, %s3339_s30 }
0x1185   :  { %1905 = vrot.lane.b32.xlu1 %v3296_v37, %s3339_s30  ;;  %v3298_v42 = vpop.eup %3297 }
0x1186   :  { %v3300_v43 = vpop.eup %3299  ;;  %v1793_v44 = vadd.f32 1.0, %v3298_v42 }
0x1187   :  { %v1896_v45 = vadd.f32 1.0, %v3300_v43  ;;  %v2377_v43 = vld [vmem:[#allocation2] sm:$0xff] }
0x1188   :  { %3301 = vrcp.f32 %v1793_v44 }
0x1189   :  { %3303 = vrcp.f32 %v1896_v45  ;;  %v2379_v45 = vmax.f32 %v2377_v43, 0.0 }
0x1192   :  { %v3302_v46 = vpop.eup %3301 }
0x1193   :  { %v3304_v49 = vpop.eup %3303  ;;  %v1797_v54 = vmul.f32 %v3302_v46, %v3691_v7 }
0x1194   :  { %v1903_v56 = vmul.f32 %v3304_v49, %v1901_v53  ;;  %v3335_v53 = vld [vmem:[%s3820_s6] ss:$0 sm:$0xff] }
0x11f6   :  { %v1800_v48 = vpop.permute.xlu0 %1799 }
0x11f7   :  { %v1802_v50 = vmul.f32 %v3302_v46, %v1800_v48  ;;  %v1906_v51 = vpop.permute.xlu1 %1905 }
0x11f8   :  { %v1908_v52 = vmul.f32 %v3304_v49, %v1906_v51 }
0x11f9   :  { %1804 = vrot.lane.b32.xlu0 %v1802_v50, %s3339_s30 }
0x11fa   :  { %1910 = vrot.lane.b32.xlu1 %v1908_v52, %s3339_s30 }
0x126b   :  { %v1805_v55 = vpop.permute.xlu0 %1804 }
0x126c   :  { %v3732_v57 = vadd.f32 %v1805_v55, %v1797_v54  ;;  %v1911_v58 = vpop.permute.xlu1 %1910 }
0x126d   :  { %v3734_v59 = vadd.f32 %v1911_v58, %v1903_v56 }
0x126e   :  { %3305 = vtanh.f32 %v3732_v57 }
0x126f   :  { %3307 = vtanh.f32 %v3734_v59  ;;  %v2180_v29 = vrot.slane %v3734_v59, 6 }
0x1278   :  { %v3306_v60 = vpop.eup %3305 }
0x1279   :  { %v3308_v61 = vpop.eup %3307  ;;  %1810 = vrot.lane.b32.xlu0 %v3306_v60, %s3339_s30 }
0x127a   :  { %1916 = vrot.lane.b32.xlu1 %v3308_v61, %s3339_s30 }
0x12eb   :  { %v1811_v62 = vpop.permute.xlu0 %1810 }
0x12ec   :  { %v1813_v63 = vmul.f32 %v3302_v46, %v1811_v62  ;;  %v1917_v1 = vpop.permute.xlu1 %1916 }
0x12ed   :  { %v1919_v2 = vmul.f32 %v3304_v49, %v1917_v1 }
0x12ee   :  { %1815 = vrot.lane.b32.xlu0 %v1813_v63, %s3340_s4 }
0x12ef   :  { %v1993_v3 = vrot.slane %v1919_v2, 4  ;;  %v2381_v2 = vld [vmem:[%s3821_s7] sm:$0xff] }
0x12f1   :  { %1994 = vrot.lane.b32.xlu1 %v1993_v3, %s3340_s4  ;;  %v2382_v3 = vld [vmem:[%s3821_s7 + $0x8] sm:$0xff] }
0x1360   :  { %v1816_v5 = vpop.permute.xlu0 %1815 }
0x1361   :  { %1818 = vst.msk [vmem:[#allocation2 + $0xa] sm:$0x3] %vm426_vm4, %v1816_v5  ;;  %2978 = vmatmul.mubr.msk.f32.vlgmr.msra.gmra.mrb[20].mxu0 %vm147_vm3, %v1816_v5  ;;  %v3186_v5 = vpack.c.bf16 %v2382_v3, %v2381_v2 }
0x1362   :  { %3170 = vmatpush3.bf16.msra.mxu0 %v3412_v4  ;;  %2999 = vmatprep.mubr.msk.f32.mxu0 %vm3337_vm2, %v3338_v8 }
0x1363   :  { %v1995_v6 = vpop.permute.xlu1 %1994  ;;  %3171 = vmatprep.subr.bf16.mxu0 %v3336_v0 }
0x1364   :  { %2989 = vmatmul.mubr.msk.f32.vlgmr.msra.gmra.mrb[20].mxu1 %vm147_vm3, %v1995_v6 }
0x1365   :  { %3176 = vmatpush3.bf16.msra.mxu1 %v3466_v32  ;;  %3010 = vmatprep.mubr.msk.f32.mxu1 %vm3337_vm2, %v3338_v8 }
0x1366   :  { %3173 = vmatpush3.bf16.msra.mxu0 %v3433_v10  ;;  %3177 = vmatprep.subr.bf16.mxu1 %v3336_v0 }
0x1367   :  { %3180 = vmatprep.subr.bf16.mxu0 %v3336_v0 }
0x1369   :  { %3000 = vmatmul.mubr.msk.f32.vlgmr.msra.gmra.mrb[22].mxu0 %vm147_vm3, %v1995_v6  ;;  %3179 = vmatpush3.bf16.msra.mxu1 %v3486_v39  ;;  %v2383_v6 = vld [vmem:[%s3821_s7 + $0x10] sm:$0xff] }
0x136a   :  { %3182 = vmatpush3.bf16.msra.mxu0 %v3477_v36  ;;  %3021 = vmatprep.mubr.msk.f32.mxu0 %vm3337_vm2, %v3338_v8 }
0x136b   :  { %3183 = vmatprep.subr.bf16.mxu0 %v3336_v0  ;;  %3187 = vmatprep.subr.bf16.mxu1 %v3186_v5 }
0x136e   :  { %3185 = vmatpush3.bf16.msra.mxu0 %v3490_v40 }
0x136f   :  { %3194 = vmatprep.subr.bf16.mxu0 %v3336_v0 }
0x1434   :  { %v1988_v4 = vpop.f32.mrb[20].mxu0 }
0x1435   :  { %v2979_v10 = vpop.f32.mrb[21].mxu0 }
0x1437   :  { %v2064_v32 = vpop.f32.mrb[20].mxu1 }
0x1438   :  { %v2065_v7 = vadd.f32 %v2064_v32, %v1988_v4  ;;  %v2990_v9 = vpop.f32.mrb[21].mxu1  ;;  %v2384_v4 = vld [vmem:[%s3821_s7 + $0x18] sm:$0xff] }
0x1439   :  { %v3190_v10 = vpack.c.bf16 %v2384_v4, %v2383_v6 }
0x143a   :  { %v2068_v11 = vadd.f32 %v3523_v47, %v2065_v7 }
0x143c   :  { %3309 = vtanh.f32 %v2068_v11  ;;  %v2164_v39 = vpop.f32.mrb[22].mxu0  ;;  %v2611_v0 = vmul.f32 -1.442695, %v2068_v11 }
0x143d   :  { %v2169_v12 = vrot.slane %v2164_v39, 2  ;;  %v3001_v36 = vpop.f32.mrb[23].mxu0 }
0x143e   :  { %v2476_v36 = vld [vmem:[%s3822_s10] sm:$0x3] }
0x143f   :  { %v2171_v14 = vadd.f32 %v2169_v12, %v3447_v13  ;;  %v3341_v12 = vmov 0  }
0x1440   :  { %3204 = vset.pattern.permute.xlu0 %v3341_v12 }
0x1441   :  { %3311 = vtanh.f32 %v2171_v14  ;;  %v2613_v17 = vmul.f32 -1.442695, %v2171_v14  ;;  %v2617_v14 = vld [vmem:[%s3823_s8] ss:$0 sm:$0xff] }
0x1442   :  { %3313 = vpow2.f32 %v2611_v0 }
0x1443   :  { %3315 = vpow2.f32 %v2613_v17 }
0x1446   :  { %v3310_v16 = vpop.eup %3309 }
0x1447   :  { %2078 = vrot.lane.b32.xlu1 %v3310_v16, %s3339_s30 }
0x144b   :  { %v3312_v40 = vpop.eup %3311 }
0x144c   :  { %2184 = vrot.lane.b32.xlu0 %v3312_v40, %s3339_s30  ;;  %v3314_v18 = vpop.eup %3313 }
0x144d   :  { %v2072_v19 = vadd.f32 1.0, %v3314_v18  ;;  %v3316_v47 = vpop.eup %3315 }
0x144e   :  { %v2175_v20 = vadd.f32 1.0, %v3316_v47 }
0x144f   :  { %3317 = vrcp.f32 %v2072_v19 }
0x1450   :  { %3319 = vrcp.f32 %v2175_v20  ;;  %v2473_v20 = vld [vmem:[%s3824_s9] sm:$0x3] }
0x1459   :  { %v3318_v21 = vpop.eup %3317 }
0x145a   :  { %v3320_v23 = vpop.eup %3319  ;;  %v2076_v26 = vmul.f32 %v3318_v21, %v3732_v57 }
0x145b   :  { %v2182_v30 = vmul.f32 %v3320_v23, %v2180_v29 }
0x14b9   :  { %v2079_v22 = vpop.permute.xlu1 %2078 }
0x14ba   :  { %v2081_v13 = vmul.f32 %v3318_v21, %v2079_v22 }
0x14bc   :  { %2083 = vrot.lane.b32.xlu1 %v2081_v13, %s3339_s30 }
0x14be   :  { %v2185_v24 = vpop.permute.xlu0 %2184 }
0x14bf   :  { %v2187_v25 = vmul.f32 %v3320_v23, %v2185_v24 }
0x14c1   :  { %2189 = vrot.lane.b32.xlu0 %v2187_v25, %s3339_s30 }
0x152e   :  { %v2084_v27 = vpop.permute.xlu1 %2083 }
0x152f   :  { %v2086_v28 = vadd.f32 %v2084_v27, %v2076_v26 }
0x1531   :  { %3321 = vtanh.f32 %v2086_v28 }
0x1533   :  { %v2190_v31 = vpop.permute.xlu0 %2189 }
0x1534   :  { %v2192_v33 = vadd.f32 %v2190_v31, %v2182_v30 }
0x1536   :  { %3323 = vtanh.f32 %v2192_v33 }
0x153b   :  { %v3322_v34 = vpop.eup %3321 }
0x153c   :  { %2089 = vrot.lane.b32.xlu1 %v3322_v34, %s3339_s30 }
0x1540   :  { %v3324_v15 = vpop.eup %3323 }
0x1541   :  { %2195 = vrot.lane.b32.xlu0 %v3324_v15, %s3339_s30 }
0x15ae   :  { %v2090_v35 = vpop.permute.xlu1 %2089 }
0x15af   :  { %v2092_v37 = vmul.f32 %v3318_v21, %v2090_v35 }
0x15b1   :  { %2094 = vrot.lane.b32.xlu0 %v2092_v37, %s3340_s4 }
0x15b3   :  { %v2196_v38 = vpop.permute.xlu0 %2195 }
0x15b4   :  { %v2198_v41 = vmul.f32 %v3320_v23, %v2196_v38 }
0x15b6   :  { %v2272_v42 = vrot.slane %v2198_v41, 6 }
0x15b8   :  { %2273 = vrot.lane.b32.xlu1 %v2272_v42, %s3340_s4 }
0x1623   :  { %v2095_v44 = vpop.permute.xlu0 %2094 }
0x1624   :  { %2097 = vst.msk [vmem:[#allocation2 + $0xc] sm:$0x3] %vm426_vm4, %v2095_v44  ;;  %3011 = vmatmul.mubr.msk.f32.vlgmr.msra.gmra.mrb[22].mxu1 %vm147_vm3, %v2095_v44 }
0x1625   :  { %3032 = vmatprep.mubr.msk.f32.mxu1 %vm147_vm3, %v2379_v45  ;;  %3189 = vmatpush3.bf16.msra.mxu1 %v3186_v5 }
0x1626   :  { %3191 = vmatprep.subr.bf16.mxu1 %v3190_v10 }
0x1629   :  { %3193 = vmatpush3.bf16.msra.mxu1 %v3190_v10 }
0x162a   :  { %v2274_v46 = vpop.permute.xlu1 %2273 }
0x162b   :  { %3022 = vmatmul.mubr.msk.f32.vlgmr.msra.gmra.mrb[24].mxu0 %vm147_vm3, %v2274_v46 }
0x162c   :  { %3039 = vmatprep.mubr.msk.f32.mxu0 %vm3337_vm2, %v3338_v8 }
0x16f7   :  { %v2267_v48 = vpop.f32.mrb[22].mxu1 }
0x16f8   :  { %v3012_v49 = vpop.f32.mrb[23].mxu1 }
0x16fe   :  { %v2343_v50 = vpop.f32.mrb[24].mxu0 }
0x16ff   :  { %v2344_v51 = vadd.f32 %v2343_v50, %v2267_v48  ;;  %v3023_v52 = vpop.f32.mrb[25].mxu0 }
0x1701   :  { %v2347_v54 = vadd.f32 %v3335_v53, %v2344_v51 }
0x1703   :  { %3325 = vtanh.f32 %v2347_v54  ;;  %v2616_v56 = vmul.f32 -1.442695, %v2347_v54 }
0x1705   :  { %3327 = vpow2.f32 %v2616_v56 }
0x170d   :  { %v3326_v55 = vpop.eup %3325 }
0x170e   :  { %2357 = vrot.lane.b32.xlu0 %v3326_v55, %s3339_s30 }
0x170f   :  { %v3328_v57 = vpop.eup %3327 }
0x1710   :  { %v2351_v58 = vadd.f32 1.0, %v3328_v57 }
0x1712   :  { %3329 = vrcp.f32 %v2351_v58 }
0x171c   :  { %v3330_v8 = vpop.eup %3329 }
0x171d   :  { %v2355_v61 = vmul.f32 %v3330_v8, %v2086_v28 }
0x1780   :  { %v2358_v59 = vpop.permute.xlu0 %2357 }
0x1781   :  { %v2360_v60 = vmul.f32 %v3330_v8, %v2358_v59 }
0x1783   :  { %2362 = vrot.lane.b32.xlu1 %v2360_v60, %s3339_s30 }
0x17f5   :  { %v2363_v62 = vpop.permute.xlu1 %2362 }
0x17f6   :  { %v2365_v63 = vadd.f32 %v2363_v62, %v2355_v61 }
0x17f8   :  { %3331 = vtanh.f32 %v2365_v63 }
0x1802   :  { %v3332_v1 = vpop.eup %3331 }
0x1803   :  { %2368 = vrot.lane.b32.xlu0 %v3332_v1, %s3339_s30 }
0x1807   :  { %2479 = vperm.xlu0 %3204, %v2476_v36  }
0x1875   :  { %v2369_v32 = vpop.permute.xlu0 %2368 }
0x1876   :  { %v2371_v7 = vmul.f32 %v3330_v8, %v2369_v32 }
0x1878   :  { %2373 = vrot.lane.b32.xlu1 %v2371_v7, %s3340_s4 }
0x1886   :  { %v2480_v21 = vpop.permute.xlu0 %2479 }
0x18ea   :  { %v2374_v9 = vpop.permute.xlu1 %2373 }
0x18eb   :  { %2376 = vst.msk [vmem:[#allocation2 + $0xe] sm:$0x3] %vm426_vm4, %v2374_v9 }
0x18f2   :  { %v2378_v11 = vld [vmem:[#allocation2 + $0x8] sm:$0xff] }
0x18f3   :  { %v2380_v39 = vmax.f32 %v2378_v11, 0.0 }
0x18f5   :  { %3033 = vmatmul.mubr.msk.f32.vlgmr.msra.gmra.mrb[24].mxu1 %vm147_vm3, %v2380_v39 }
0x19c8   :  { %v3034_v16 = vpop.f32.mrb[24].mxu1 }
0x19c9   :  { %v2470_v40 = vadd.f32 %v3034_v16, %v2617_v14  ;;  %v2464_v0 = vpop.f32.mrb[25].mxu1 }
0x19ca   :  { %v2465_v17 = vadd.f32 %v2617_v14, %v2464_v0 }
0x19cb   :  { %v2475_v18 = vmax.f32 %v2470_v40, 0.0 }
0x19cc   :  { %v2474_v19 = vmax.f32 %v2465_v17, 0.0 }
0x19ce   :  { %v3195_v47 = vpack.c.bf16 %v2475_v18, %v2474_v19 }
0x19d0   :  { %3197 = vmatpush3.bf16.xpose.msk.msra.mxu0 %vm3196_vm6, %v3195_v47 }
0x19d7   :  { %3040 = vmatmul.mubr.msk.f32.vlgmr.msra.gmra.mrb[26].mxu0 %vm2482_vm5, %v2473_v20 }
0x1aaa   :  { %v2558_v22 = vpop.f32.mrb[26].mxu0 }
0x1aab   :  { %v2559_v13 = vadd.f32 %v2558_v22, %v2480_v21  ;;  %v3041_v23 = vpop.f32.mrb[27].mxu0 }
0x1aad   :  { %v2562_v24 = vmul.f32 1.442695, %v2559_v13 }
0x1aaf   :  { %3333 = vpow2.f32 %v2562_v24 }
0x1ab9   :  { %v3334_v25 = vpop.eup %3333 }
0x1aba   :  { %v2565_v26 = vrot.slane %v3334_v25, 1 }
0x1abc   :  { %v2567_v27 = vmul.f32 %v2565_v26, %v2559_v13 }
0x1abe   :  { %2569 = vst.msk [vmem:[%s3825_s11] sm:$0x1] %vm2568_vm7, %v2567_v27 }

</bundles_post_ra>
